<compile_context>
chip_gen: v7x
topology: tpu7x:2x2x1
jax: 0.10.0
libtpu: 0.0.40
codegen_flags: <defaults>
</compile_context>

<pallas_src>
import functools

import jax
import jax.numpy as jnp
from jax.experimental import pallas as pl
from jax.experimental.pallas import tpu as pltpu


# ----------------------------------------------------------------------------
# Small helpers
# ----------------------------------------------------------------------------
def _round_up(x, m):
    return (x + m - 1) // m * m


def _tile_dim(dim, unit, max_tile):
    """Return (padded_dim, tile) with tile | padded_dim and tile % unit == 0."""
    padded = _round_up(dim, unit)
    if padded <= max_tile:
        return padded, padded
    return _round_up(dim, max_tile), max_tile


# ----------------------------------------------------------------------------
# Pallas kernel: tiled im2col-conv matmul with fused epilogue
# ----------------------------------------------------------------------------
def _conv_kernel(*refs, slope, add_bias, with_stats, use_scratch):
    """grid = (j: Cout tiles, i: M tiles, k: K tiles).

    bf16 inputs, f32 accumulation.  Epilogue at k == nk-1 adds bias / LeakyReLU
    and (optionally) writes per-(i, j)-tile channel sum / sum-of-squares for a
    fused BatchNorm.  When the output dtype is f32 the resident output block is
    used as the accumulator (no scratch).
    """
    it = iter(refs)
    p_ref = next(it)
    w_ref = next(it)
    b_ref = next(it) if add_bias else None
    o_ref = next(it)
    if with_stats:
        sum_ref = next(it)
        sq_ref = next(it)
    acc_ref = next(it) if use_scratch else o_ref

    k = pl.program_id(2)
    nk = pl.num_programs(2)

    @pl.when(k == 0)
    def _():
        acc_ref[...] = jnp.zeros_like(acc_ref)

    acc_ref[...] += jnp.dot(p_ref[...], w_ref[...],
                            preferred_element_type=jnp.float32)

    @pl.when(k == nk - 1)
    def _():
        y = acc_ref[...]
        if add_bias:
            y = y + b_ref[...]
        if with_stats:
            # Per-(i, j)-tile partial sums; padded M rows are all-zero patches
            # (no bias added on BN layers) so they contribute exactly zero.
            sum_ref[...] = jnp.sum(y, axis=0, keepdims=True)[None]
            sq_ref[...] = jnp.sum(y * y, axis=0, keepdims=True)[None]
        if slope is not None:
            y = jnp.where(y >= 0, y, slope * y)
        o_ref[...] = y.astype(o_ref.dtype)


def _conv_pallas(p, w, b, tm, tn, tk, *, slope, add_bias, with_stats,
                 out_dtype):
    Mp, Kp = p.shape
    _, Cp = w.shape
    nj, ni, nk = Cp // tn, Mp // tm, Kp // tk

    use_scratch = out_dtype != jnp.float32

    in_specs = [
        pl.BlockSpec((tm, tk), lambda j, i, k: (i, k)),   # patches
        pl.BlockSpec((tk, tn), lambda j, i, k: (k, j)),   # weights
    ]
    args = [p, w]
    if add_bias:
        in_specs.append(pl.BlockSpec((1, tn), lambda j, i, k: (0, j)))
        args.append(b)

    out_shapes = [jax.ShapeDtypeStruct((Mp, Cp), out_dtype)]
    out_specs = [pl.BlockSpec((tm, tn), lambda j, i, k: (i, j))]
    if with_stats:
        out_shapes += [jax.ShapeDtypeStruct((ni, 1, Cp), jnp.float32)] * 2
        out_specs += [pl.BlockSpec((1, 1, tn), lambda j, i, k: (i, 0, j))] * 2

    scratch = [pltpu.VMEM((tm, tn), jnp.float32)] if use_scratch else []

    res = pl.pallas_call(
        functools.partial(_conv_kernel, slope=slope, add_bias=add_bias,
                          with_stats=with_stats, use_scratch=use_scratch),
        out_shape=tuple(out_shapes),
        grid_spec=pltpu.PrefetchScalarGridSpec(
            num_scalar_prefetch=0,
            grid=(nj, ni, nk),
            in_specs=in_specs,
            out_specs=tuple(out_specs),
            scratch_shapes=scratch,
        ),
        compiler_params=pltpu.CompilerParams(
            # No cross-step accumulation on j or i (stats are per-i partials),
            # only k carries the reduction -> megacore can shard j and i.
            dimension_semantics=("parallel", "parallel", "arbitrary"),
            vmem_limit_bytes=32 * 1024 * 1024),
    )(*args)
    return res if with_stats else res[0]


# ----------------------------------------------------------------------------
# Glue: im2col (bf16) and one conv layer
# ----------------------------------------------------------------------------
def _im2col(x_nhwc, k, stride, pad):
    """x: (N,H,W,C) -> patches (N*Ho*Wo, k*k*C), K ordering (kh, kw, C)."""
    x = jnp.pad(x_nhwc, ((0, 0), (pad, pad), (pad, pad), (0, 0)))
    N, H, W, C = x.shape
    Ho = (H - k) // stride + 1
    Wo = (W - k) // stride + 1
    slabs = []
    for i in range(k):
        for j in range(k):
            slabs.append(x[:, i:i + Ho * stride:stride,
                            j:j + Wo * stride:stride, :])
    p = jnp.stack(slabs, axis=3)                    # (N, Ho, Wo, k*k, C)
    return p.reshape(N * Ho * Wo, k * k * C), N, Ho, Wo


def _conv_layer(x_nhwc, w, b, stride, *, fuse_lrelu, with_stats, pre_affine,
                out_dtype):
    """Conv2d (PyTorch weight layout (Cout,Cin,KH,KW)) via tiled Pallas matmul.

    `pre_affine` (scale, shift) is the previous layer's folded BatchNorm; it is
    applied (plus LeakyReLU 0.2) as part of this layer's fused XLA patch
    construction so the activation is read from HBM exactly once.
    """
    Cout, Cin, KH, KW = w.shape

    if pre_affine is not None:
        scale, shift = pre_affine
        y = x_nhwc.astype(jnp.float32) * scale + shift
        x_nhwc = jnp.where(y >= 0.0, y, 0.2 * y)
    x_nhwc = x_nhwc.astype(jnp.bfloat16)   # patch matrix never hits HBM in f32

    patches, N, Ho, Wo = _im2col(x_nhwc, KH, stride, 1)
    M, K = patches.shape

    Mp, tm = _tile_dim(M, 16, 1024)      # bf16-friendly sublane multiple
    Kp, tk = _tile_dim(K, 256, 1024)     # multiple of 256 for v6e/v7x MXU
    Cp, tn = _tile_dim(Cout, 128, 256)   # lane-dense output store

    p_pad = jnp.pad(patches, ((0, Mp - M), (0, Kp - K)))          # bf16
    w2 = jnp.transpose(w, (2, 3, 1, 0)).reshape(KH * KW * Cin, Cout)
    w_pad = jnp.pad(w2, ((0, Kp - K), (0, Cp - Cout))).astype(jnp.bfloat16)

    add_bias = not with_stats            # bias is cancelled exactly by BN
    b_pad = None
    if add_bias:
        b_pad = jnp.pad(b, (0, Cp - Cout)).reshape(1, Cp).astype(jnp.float32)

    res = _conv_pallas(p_pad, w_pad, b_pad, tm, tn, tk,
                       slope=0.2 if fuse_lrelu else None,
                       add_bias=add_bias, with_stats=with_stats,
                       out_dtype=out_dtype)
    return res, (N, Ho, Wo, M, Cout, Cp)


# ----------------------------------------------------------------------------
# Parameters (static layer config kept OUT of the traced pytree)
# ----------------------------------------------------------------------------
def make_discriminator(key, in_channels=6, ndf=64, n_layers=3):
    specs = [(in_channels, ndf, 2, False, True)]         # conv + LeakyReLU
    nf_mult = 1
    for n in range(1, n_layers):
        nf_prev, nf_mult = nf_mult, min(2 ** n, 8)
        specs.append((ndf * nf_prev, ndf * nf_mult, 2, True, False))
    nf_prev, nf_mult = nf_mult, min(2 ** n_layers, 8)
    specs.append((ndf * nf_prev, ndf * nf_mult, 1, True, False))
    specs.append((ndf * nf_mult, 1, 1, False, False))    # final conv head

    cfg, params = [], []
    for cin, cout, stride, has_bn, fuse in specs:
        key, kw, kb = jax.random.split(key, 3)
        layer = {
            "w": 0.02 * jax.random.normal(kw, (cout, cin, 4, 4), jnp.float32),
            "b": 0.01 * jax.random.normal(kb, (cout,), jnp.float32),
        }
        if has_bn:
            layer["gamma"] = jnp.ones((cout,), jnp.float32)
            layer["beta"] = jnp.zeros((cout,), jnp.float32)
        params.append(layer)
        cfg.append((stride, has_bn, fuse))
    return tuple(cfg), params


# ----------------------------------------------------------------------------
# Full forward pass
# ----------------------------------------------------------------------------
def patchgan_forward(params, left_img, right_img, *, cfg):
    """left_img / right_img: NCHW float32.  Returns NCHW (N, 1, Ho, Wo) f32."""
    x = jnp.concatenate([left_img, right_img], axis=1)       # (N, 6, H, W)
    x = jnp.transpose(x, (0, 2, 3, 1))                       # NHWC

    eps = 1e-5
    pending = None                       # folded (scale, shift) of previous BN
    n_total = len(cfg)
    for li, (layer, (stride, has_bn, fuse_lrelu)) in enumerate(zip(params, cfg)):
        is_last = li == n_total - 1
        out_dtype = jnp.float32 if is_last else jnp.bfloat16

        res, (N, Ho, Wo, M, Cout, Cp) = _conv_layer(
            x, layer["w"], layer["b"], stride,
            fuse_lrelu=fuse_lrelu, with_stats=has_bn,
            pre_affine=pending, out_dtype=out_dtype)

        if has_bn:
            y_pad, sums, sqs = res
            s1 = jnp.sum(sums, axis=(0, 1))                  # (Cp,)
            s2 = jnp.sum(sqs, axis=(0, 1))
            # Training-mode batch statistics (biased variance), as a fresh
            # nn.BatchNorm2d uses in .train() mode.  E[y^2]-E[y]^2 in f32 is
            # adequate at BN-scale activations.
            mean = s1 / M
            var = jnp.maximum(s2 / M - mean * mean, 0.0)
            scale = layer["gamma"] * jax.lax.rsqrt(var[:Cout] + eps)
            shift = layer["beta"] - mean[:Cout] * scale
            pending = (scale, shift)     # applied by the next layer's consumer
        else:
            y_pad = res
            pending = None

        x = y_pad[:M, :Cout].reshape(N, Ho, Wo, Cout)

    return jnp.transpose(x, (0, 3, 1, 2))                    # back to NCHW


if __name__ == "__main__":
    key = jax.random.PRNGKey(0)
    k_params, k_left, k_right = jax.random.split(key, 3)

    # Small but structurally faithful instantiation:
    # in_channels = 6 (3 + 3), ndf = 16, n_layers = 3, spatial 32x32, batch 2.
    cfg, params = make_discriminator(k_params, in_channels=6, ndf=16,
                                     n_layers=3)

    left = jax.random.normal(k_left, (2, 3, 32, 32), jnp.float32)
    right = jax.random.normal(k_right, (2, 3, 32, 32), jnp.float32)

    fwd = jax.jit(functools.partial(patchgan_forward, cfg=cfg))
    out = fwd(params, left, right)
    jax.block_until_ready(out)

    # PatchGAN output map: 32 -> 16 -> 8 -> 4 -> 3 -> 2 spatial, 1 channel.
    assert out.shape == (2, 1, 2, 2), out.shape
    assert out.dtype == jnp.float32
    print("KERNEL_OK")
</pallas_src>

<mosaic_0001>
module attributes {stable_mosaic.version = 11 : i64} {
  func.func @_conv_kernel(%arg0: i32, %arg1: i32, %arg2: i32, %arg3: memref<512x256xbf16, #tpu.memory_space<vmem>>, %arg4: memref<256x128xbf16, #tpu.memory_space<vmem>>, %arg5: memref<1x128xf32, #tpu.memory_space<vmem>>, %arg6: memref<512x128xbf16, #tpu.memory_space<vmem>>, %arg7: memref<512x128xf32, #tpu.memory_space<vmem>>) attributes {dimension_semantics = [#tpu.dimension_semantics<parallel>, #tpu.dimension_semantics<parallel>, #tpu.dimension_semantics<arbitrary>], iteration_bounds = array<i64: 1, 1, 1>, scalar_prefetch = 0 : i64, scratch_operands = 1 : i64, tpu.core_type = #tpu.core_type<tc>, window_params = [{transform_indices = @transform_0, window_bounds = array<i64: 512, 256>}, {transform_indices = @transform_1, window_bounds = array<i64: 256, 128>}, {transform_indices = @transform_2, window_bounds = array<i64: 1, 128>}, {transform_indices = @transform_3, window_bounds = array<i64: 512, 128>}]} {
    %c0_i32 = arith.constant 0 : i32
    %0 = arith.cmpi eq, %arg2, %c0_i32 : i32
    %1 = arith.extui %0 : i1 to i32
    %c0_i32_0 = arith.constant 0 : i32
    %2 = arith.cmpi ne, %1, %c0_i32_0 : i32
    scf.if %2 {
      %cst_10 = arith.constant 0.000000e+00 : f32
      %12 = vector.broadcast %cst_10 : f32 to vector<512x128xf32>
      %c0_11 = arith.constant 0 : index
      %c0_12 = arith.constant 0 : index
      %13 = vector.load %arg7[%c0_11, %c0_12] : memref<512x128xf32, #tpu.memory_space<vmem>>, vector<512x128xf32>
      tpu.vector_store %arg7[%c0_11, %c0_12], %12 {strides = array<i32>} : memref<512x128xf32, #tpu.memory_space<vmem>>, vector<512x128xf32>,
    } else {
    }
    %c0 = arith.constant 0 : index
    %c0_1 = arith.constant 0 : index
    %3 = vector.load %arg7[%c0, %c0_1] : memref<512x128xf32, #tpu.memory_space<vmem>>, vector<512x128xf32>
    %c0_2 = arith.constant 0 : index
    %c0_3 = arith.constant 0 : index
    %4 = vector.load %arg3[%c0_2, %c0_3] : memref<512x256xbf16, #tpu.memory_space<vmem>>, vector<512x256xbf16>
    %c0_4 = arith.constant 0 : index
    %c0_5 = arith.constant 0 : index
    %5 = vector.load %arg4[%c0_4, %c0_5] : memref<256x128xbf16, #tpu.memory_space<vmem>>, vector<256x128xbf16>
    %cst = arith.constant dense<0.000000e+00> : vector<512x128xf32>
    %6 = tpu.matmul %4, %5, %cst {dimension_numbers = #tpu.dot_dimension_numbers<[1], [0], [0], [1], [0, 0, 1, 1], [], []>} : vector<512x256xbf16>, vector<256x128xbf16>, vector<512x128xf32> -> vector<512x128xf32>
    %7 = arith.addf %3, %6 : vector<512x128xf32>
    %c0_6 = arith.constant 0 : index
    %c0_7 = arith.constant 0 : index
    %8 = vector.load %arg7[%c0_6, %c0_7] : memref<512x128xf32, #tpu.memory_space<vmem>>, vector<512x128xf32>
    tpu.vector_store %arg7[%c0_6, %c0_7], %7 {strides = array<i32>} : memref<512x128xf32, #tpu.memory_space<vmem>>, vector<512x128xf32>,
    %c0_i32_8 = arith.constant 0 : i32
    %9 = arith.cmpi eq, %arg2, %c0_i32_8 : i32
    %10 = arith.extui %9 : i1 to i32
    %c0_i32_9 = arith.constant 0 : i32
    %11 = arith.cmpi ne, %10, %c0_i32_9 : i32
    scf.if %11 {
      %c0_10 = arith.constant 0 : index
      %c0_11 = arith.constant 0 : index
      %12 = vector.load %arg7[%c0_10, %c0_11] : memref<512x128xf32, #tpu.memory_space<vmem>>, vector<512x128xf32>
      %c0_12 = arith.constant 0 : index
      %c0_13 = arith.constant 0 : index
      %13 = vector.load %arg5[%c0_12, %c0_13] : memref<1x128xf32, #tpu.memory_space<vmem>>, vector<1x128xf32>
      %14 = vector.broadcast %13 : vector<1x128xf32> to vector<512x128xf32>
      %15 = arith.addf %12, %14 : vector<512x128xf32>
      %cst_14 = arith.constant 0.000000e+00 : f32
      %16 = vector.broadcast %cst_14 : f32 to vector<512x128xf32>
      %17 = arith.cmpf oge, %15, %16 : vector<512x128xf32>
      %cst_15 = arith.constant 2.000000e-01 : f32
      %18 = vector.broadcast %cst_15 : f32 to vector<512x128xf32>
      %19 = arith.mulf %18, %15 : vector<512x128xf32>
      %20 = arith.select %17, %15, %19 : vector<512x128xi1>, vector<512x128xf32>
      %21 = arith.truncf %20 : vector<512x128xf32> to vector<512x128xbf16>
      %c0_16 = arith.constant 0 : index
      %c0_17 = arith.constant 0 : index
      %22 = vector.load %arg6[%c0_16, %c0_17] : memref<512x128xbf16, #tpu.memory_space<vmem>>, vector<512x128xbf16>
      tpu.vector_store %arg6[%c0_16, %c0_17], %21 {strides = array<i32>} : memref<512x128xbf16, #tpu.memory_space<vmem>>, vector<512x128xbf16>,
    } else {
    }
    return
  }
  func.func @transform_0(%arg0: i32, %arg1: i32, %arg2: i32) -> (i32, i32) {
    %c0_i32 = arith.constant 0 : i32
    return %arg1, %arg2 : i32, i32
  }
  func.func @transform_1(%arg0: i32, %arg1: i32, %arg2: i32) -> (i32, i32) {
    %c0_i32 = arith.constant 0 : i32
    return %arg2, %arg0 : i32, i32
  }
  func.func @transform_2(%arg0: i32, %arg1: i32, %arg2: i32) -> (i32, i32) {
    %c0_i32 = arith.constant 0 : i32
    %c0_i32_0 = arith.constant 0 : i32
    return %c0_i32, %arg0 : i32, i32
  }
  func.func @transform_3(%arg0: i32, %arg1: i32, %arg2: i32) -> (i32, i32) {
    %c0_i32 = arith.constant 0 : i32
    return %arg1, %arg0 : i32, i32
  }
}

module attributes {stable_mosaic.version = 11 : i64} {
  func.func @_conv_kernel(%arg0: i32, %arg1: i32, %arg2: i32, %arg3: memref<128x256xbf16, #tpu.memory_space<vmem>>, %arg4: memref<256x128xbf16, #tpu.memory_space<vmem>>, %arg5: memref<128x128xbf16, #tpu.memory_space<vmem>>, %arg6: memref<1x1x128xf32, #tpu.memory_space<vmem>>, %arg7: memref<1x1x128xf32, #tpu.memory_space<vmem>>, %arg8: memref<128x128xf32, #tpu.memory_space<vmem>>) attributes {dimension_semantics = [#tpu.dimension_semantics<parallel>, #tpu.dimension_semantics<parallel>, #tpu.dimension_semantics<arbitrary>], iteration_bounds = array<i64: 1, 1, 1>, scalar_prefetch = 0 : i64, scratch_operands = 1 : i64, tpu.core_type = #tpu.core_type<tc>, window_params = [{transform_indices = @transform_0, window_bounds = array<i64: 128, 256>}, {transform_indices = @transform_1, window_bounds = array<i64: 256, 128>}, {transform_indices = @transform_2, window_bounds = array<i64: 128, 128>}, {transform_indices = @transform_3, window_bounds = array<i64: 1, 1, 128>}, {transform_indices = @transform_4, window_bounds = array<i64: 1, 1, 128>}]} {
    %c0_i32 = arith.constant 0 : i32
    %0 = arith.cmpi eq, %arg2, %c0_i32 : i32
    %1 = arith.extui %0 : i1 to i32
    %c0_i32_0 = arith.constant 0 : i32
    %2 = arith.cmpi ne, %1, %c0_i32_0 : i32
    scf.if %2 {
      %cst_10 = arith.constant 0.000000e+00 : f32
      %12 = vector.broadcast %cst_10 : f32 to vector<128x128xf32>
      %c0_11 = arith.constant 0 : index
      %c0_12 = arith.constant 0 : index
      %13 = vector.load %arg8[%c0_11, %c0_12] : memref<128x128xf32, #tpu.memory_space<vmem>>, vector<128x128xf32>
      tpu.vector_store %arg8[%c0_11, %c0_12], %12 {strides = array<i32>} : memref<128x128xf32, #tpu.memory_space<vmem>>, vector<128x128xf32>,
    } else {
    }
    %c0 = arith.constant 0 : index
    %c0_1 = arith.constant 0 : index
    %3 = vector.load %arg8[%c0, %c0_1] : memref<128x128xf32, #tpu.memory_space<vmem>>, vector<128x128xf32>
    %c0_2 = arith.constant 0 : index
    %c0_3 = arith.constant 0 : index
    %4 = vector.load %arg3[%c0_2, %c0_3] : memref<128x256xbf16, #tpu.memory_space<vmem>>, vector<128x256xbf16>
    %c0_4 = arith.constant 0 : index
    %c0_5 = arith.constant 0 : index
    %5 = vector.load %arg4[%c0_4, %c0_5] : memref<256x128xbf16, #tpu.memory_space<vmem>>, vector<256x128xbf16>
    %cst = arith.constant dense<0.000000e+00> : vector<128x128xf32>
    %6 = tpu.matmul %4, %5, %cst {dimension_numbers = #tpu.dot_dimension_numbers<[1], [0], [0], [1], [0, 0, 1, 1], [], []>} : vector<128x256xbf16>, vector<256x128xbf16>, vector<128x128xf32> -> vector<128x128xf32>
    %7 = arith.addf %3, %6 : vector<128x128xf32>
    %c0_6 = arith.constant 0 : index
    %c0_7 = arith.constant 0 : index
    %8 = vector.load %arg8[%c0_6, %c0_7] : memref<128x128xf32, #tpu.memory_space<vmem>>, vector<128x128xf32>
    tpu.vector_store %arg8[%c0_6, %c0_7], %7 {strides = array<i32>} : memref<128x128xf32, #tpu.memory_space<vmem>>, vector<128x128xf32>,
    %c0_i32_8 = arith.constant 0 : i32
    %9 = arith.cmpi eq, %arg2, %c0_i32_8 : i32
    %10 = arith.extui %9 : i1 to i32
    %c0_i32_9 = arith.constant 0 : i32
    %11 = arith.cmpi ne, %10, %c0_i32_9 : i32
    scf.if %11 {
      %c0_10 = arith.constant 0 : index
      %c0_11 = arith.constant 0 : index
      %12 = vector.load %arg8[%c0_10, %c0_11] : memref<128x128xf32, #tpu.memory_space<vmem>>, vector<128x128xf32>
      %cst_12 = arith.constant dense<0.000000e+00> : vector<128xf32>
      %13 = vector.multi_reduction <add>, %12, %cst_12 [0] : vector<128x128xf32> to vector<128xf32>
      %14 = vector.shape_cast %13 : vector<128xf32> to vector<1x128xf32>
      %15 = vector.shape_cast %14 : vector<1x128xf32> to vector<1x1x128xf32>
      %c0_13 = arith.constant 0 : index
      %c0_14 = arith.constant 0 : index
      %c0_15 = arith.constant 0 : index
      %16 = vector.load %arg6[%c0_13, %c0_14, %c0_15] : memref<1x1x128xf32, #tpu.memory_space<vmem>>, vector<1x1x128xf32>
      tpu.vector_store %arg6[%c0_13, %c0_14, %c0_15], %15 {strides = array<i32>} : memref<1x1x128xf32, #tpu.memory_space<vmem>>, vector<1x1x128xf32>,
      %17 = arith.mulf %12, %12 : vector<128x128xf32>
      %cst_16 = arith.constant dense<0.000000e+00> : vector<128xf32>
      %18 = vector.multi_reduction <add>, %17, %cst_16 [0] : vector<128x128xf32> to vector<128xf32>
      %19 = vector.shape_cast %18 : vector<128xf32> to vector<1x128xf32>
      %20 = vector.shape_cast %19 : vector<1x128xf32> to vector<1x1x128xf32>
      %c0_17 = arith.constant 0 : index
      %c0_18 = arith.constant 0 : index
      %c0_19 = arith.constant 0 : index
      %21 = vector.load %arg7[%c0_17, %c0_18, %c0_19] : memref<1x1x128xf32, #tpu.memory_space<vmem>>, vector<1x1x128xf32>
      tpu.vector_store %arg7[%c0_17, %c0_18, %c0_19], %20 {strides = array<i32>} : memref<1x1x128xf32, #tpu.memory_space<vmem>>, vector<1x1x128xf32>,
      %22 = arith.truncf %12 : vector<128x128xf32> to vector<128x128xbf16>
      %c0_20 = arith.constant 0 : index
      %c0_21 = arith.constant 0 : index
      %23 = vector.load %arg5[%c0_20, %c0_21] : memref<128x128xbf16, #tpu.memory_space<vmem>>, vector<128x128xbf16>
      tpu.vector_store %arg5[%c0_20, %c0_21], %22 {strides = array<i32>} : memref<128x128xbf16, #tpu.memory_space<vmem>>, vector<128x128xbf16>,
    } else {
    }
    return
  }
  func.func @transform_0(%arg0: i32, %arg1: i32, %arg2: i32) -> (i32, i32) {
    %c0_i32 = arith.constant 0 : i32
    return %arg1, %arg2 : i32, i32
  }
  func.func @transform_1(%arg0: i32, %arg1: i32, %arg2: i32) -> (i32, i32) {
    %c0_i32 = arith.constant 0 : i32
    return %arg2, %arg0 : i32, i32
  }
  func.func @transform_2(%arg0: i32, %arg1: i32, %arg2: i32) -> (i32, i32) {
    %c0_i32 = arith.constant 0 : i32
    return %arg1, %arg0 : i32, i32
  }
  func.func @transform_3(%arg0: i32, %arg1: i32, %arg2: i32) -> (i32, i32, i32) {
    %c0_i32 = arith.constant 0 : i32
    %c0_i32_0 = arith.constant 0 : i32
    return %arg1, %c0_i32, %arg0 : i32, i32, i32
  }
  func.func @transform_4(%arg0: i32, %arg1: i32, %arg2: i32) -> (i32, i32, i32) {
    %c0_i32 = arith.constant 0 : i32
    %c0_i32_0 = arith.constant 0 : i32
    return %arg1, %c0_i32, %arg0 : i32, i32, i32
  }
}

module attributes {stable_mosaic.version = 11 : i64} {
  func.func @_conv_kernel(%arg0: i32, %arg1: i32, %arg2: i32, %arg3: memref<32x512xbf16, #tpu.memory_space<vmem>>, %arg4: memref<512x128xbf16, #tpu.memory_space<vmem>>, %arg5: memref<32x128xbf16, #tpu.memory_space<vmem>>, %arg6: memref<1x1x128xf32, #tpu.memory_space<vmem>>, %arg7: memref<1x1x128xf32, #tpu.memory_space<vmem>>, %arg8: memref<32x128xf32, #tpu.memory_space<vmem>>) attributes {dimension_semantics = [#tpu.dimension_semantics<parallel>, #tpu.dimension_semantics<parallel>, #tpu.dimension_semantics<arbitrary>], iteration_bounds = array<i64: 1, 1, 1>, scalar_prefetch = 0 : i64, scratch_operands = 1 : i64, tpu.core_type = #tpu.core_type<tc>, window_params = [{transform_indices = @transform_0, window_bounds = array<i64: 32, 512>}, {transform_indices = @transform_1, window_bounds = array<i64: 512, 128>}, {transform_indices = @transform_2, window_bounds = array<i64: 32, 128>}, {transform_indices = @transform_3, window_bounds = array<i64: 1, 1, 128>}, {transform_indices = @transform_4, window_bounds = array<i64: 1, 1, 128>}]} {
    %c0_i32 = arith.constant 0 : i32
    %0 = arith.cmpi eq, %arg2, %c0_i32 : i32
    %1 = arith.extui %0 : i1 to i32
    %c0_i32_0 = arith.constant 0 : i32
    %2 = arith.cmpi ne, %1, %c0_i32_0 : i32
    scf.if %2 {
      %cst_10 = arith.constant 0.000000e+00 : f32
      %12 = vector.broadcast %cst_10 : f32 to vector<32x128xf32>
      %c0_11 = arith.constant 0 : index
      %c0_12 = arith.constant 0 : index
      %13 = vector.load %arg8[%c0_11, %c0_12] : memref<32x128xf32, #tpu.memory_space<vmem>>, vector<32x128xf32>
      tpu.vector_store %arg8[%c0_11, %c0_12], %12 {strides = array<i32>} : memref<32x128xf32, #tpu.memory_space<vmem>>, vector<32x128xf32>,
    } else {
    }
    %c0 = arith.constant 0 : index
    %c0_1 = arith.constant 0 : index
    %3 = vector.load %arg8[%c0, %c0_1] : memref<32x128xf32, #tpu.memory_space<vmem>>, vector<32x128xf32>
    %c0_2 = arith.constant 0 : index
    %c0_3 = arith.constant 0 : index
    %4 = vector.load %arg3[%c0_2, %c0_3] : memref<32x512xbf16, #tpu.memory_space<vmem>>, vector<32x512xbf16>
    %c0_4 = arith.constant 0 : index
    %c0_5 = arith.constant 0 : index
    %5 = vector.load %arg4[%c0_4, %c0_5] : memref<512x128xbf16, #tpu.memory_space<vmem>>, vector<512x128xbf16>
    %cst = arith.constant dense<0.000000e+00> : vector<32x128xf32>
    %6 = tpu.matmul %4, %5, %cst {dimension_numbers = #tpu.dot_dimension_numbers<[1], [0], [0], [1], [0, 0, 1, 1], [], []>} : vector<32x512xbf16>, vector<512x128xbf16>, vector<32x128xf32> -> vector<32x128xf32>
    %7 = arith.addf %3, %6 : vector<32x128xf32>
    %c0_6 = arith.constant 0 : index
    %c0_7 = arith.constant 0 : index
    %8 = vector.load %arg8[%c0_6, %c0_7] : memref<32x128xf32, #tpu.memory_space<vmem>>, vector<32x128xf32>
    tpu.vector_store %arg8[%c0_6, %c0_7], %7 {strides = array<i32>} : memref<32x128xf32, #tpu.memory_space<vmem>>, vector<32x128xf32>,
    %c0_i32_8 = arith.constant 0 : i32
    %9 = arith.cmpi eq, %arg2, %c0_i32_8 : i32
    %10 = arith.extui %9 : i1 to i32
    %c0_i32_9 = arith.constant 0 : i32
    %11 = arith.cmpi ne, %10, %c0_i32_9 : i32
    scf.if %11 {
      %c0_10 = arith.constant 0 : index
      %c0_11 = arith.constant 0 : index
      %12 = vector.load %arg8[%c0_10, %c0_11] : memref<32x128xf32, #tpu.memory_space<vmem>>, vector<32x128xf32>
      %cst_12 = arith.constant dense<0.000000e+00> : vector<128xf32>
      %13 = vector.multi_reduction <add>, %12, %cst_12 [0] : vector<32x128xf32> to vector<128xf32>
      %14 = vector.shape_cast %13 : vector<128xf32> to vector<1x128xf32>
      %15 = vector.shape_cast %14 : vector<1x128xf32> to vector<1x1x128xf32>
      %c0_13 = arith.constant 0 : index
      %c0_14 = arith.constant 0 : index
      %c0_15 = arith.constant 0 : index
      %16 = vector.load %arg6[%c0_13, %c0_14, %c0_15] : memref<1x1x128xf32, #tpu.memory_space<vmem>>, vector<1x1x128xf32>
      tpu.vector_store %arg6[%c0_13, %c0_14, %c0_15], %15 {strides = array<i32>} : memref<1x1x128xf32, #tpu.memory_space<vmem>>, vector<1x1x128xf32>,
      %17 = arith.mulf %12, %12 : vector<32x128xf32>
      %cst_16 = arith.constant dense<0.000000e+00> : vector<128xf32>
      %18 = vector.multi_reduction <add>, %17, %cst_16 [0] : vector<32x128xf32> to vector<128xf32>
      %19 = vector.shape_cast %18 : vector<128xf32> to vector<1x128xf32>
      %20 = vector.shape_cast %19 : vector<1x128xf32> to vector<1x1x128xf32>
      %c0_17 = arith.constant 0 : index
      %c0_18 = arith.constant 0 : index
      %c0_19 = arith.constant 0 : index
      %21 = vector.load %arg7[%c0_17, %c0_18, %c0_19] : memref<1x1x128xf32, #tpu.memory_space<vmem>>, vector<1x1x128xf32>
      tpu.vector_store %arg7[%c0_17, %c0_18, %c0_19], %20 {strides = array<i32>} : memref<1x1x128xf32, #tpu.memory_space<vmem>>, vector<1x1x128xf32>,
      %22 = arith.truncf %12 : vector<32x128xf32> to vector<32x128xbf16>
      %c0_20 = arith.constant 0 : index
      %c0_21 = arith.constant 0 : index
      %23 = vector.load %arg5[%c0_20, %c0_21] : memref<32x128xbf16, #tpu.memory_space<vmem>>, vector<32x128xbf16>
      tpu.vector_store %arg5[%c0_20, %c0_21], %22 {strides = array<i32>} : memref<32x128xbf16, #tpu.memory_space<vmem>>, vector<32x128xbf16>,
    } else {
    }
    return
  }
  func.func @transform_0(%arg0: i32, %arg1: i32, %arg2: i32) -> (i32, i32) {
    %c0_i32 = arith.constant 0 : i32
    return %arg1, %arg2 : i32, i32
  }
  func.func @transform_1(%arg0: i32, %arg1: i32, %arg2: i32) -> (i32, i32) {
    %c0_i32 = arith.constant 0 : i32
    return %arg2, %arg0 : i32, i32
  }
  func.func @transform_2(%arg0: i32, %arg1: i32, %arg2: i32) -> (i32, i32) {
    %c0_i32 = arith.constant 0 : i32
    return %arg1, %arg0 : i32, i32
  }
  func.func @transform_3(%arg0: i32, %arg1: i32, %arg2: i32) -> (i32, i32, i32) {
    %c0_i32 = arith.constant 0 : i32
    %c0_i32_0 = arith.constant 0 : i32
    return %arg1, %c0_i32, %arg0 : i32, i32, i32
  }
  func.func @transform_4(%arg0: i32, %arg1: i32, %arg2: i32) -> (i32, i32, i32) {
    %c0_i32 = arith.constant 0 : i32
    %c0_i32_0 = arith.constant 0 : i32
    return %arg1, %c0_i32, %arg0 : i32, i32, i32
  }
}

module attributes {stable_mosaic.version = 11 : i64} {
  func.func @_conv_kernel(%arg0: i32, %arg1: i32, %arg2: i32, %arg3: memref<32x1024xbf16, #tpu.memory_space<vmem>>, %arg4: memref<1024x128xbf16, #tpu.memory_space<vmem>>, %arg5: memref<32x128xbf16, #tpu.memory_space<vmem>>, %arg6: memref<1x1x128xf32, #tpu.memory_space<vmem>>, %arg7: memref<1x1x128xf32, #tpu.memory_space<vmem>>, %arg8: memref<32x128xf32, #tpu.memory_space<vmem>>) attributes {dimension_semantics = [#tpu.dimension_semantics<parallel>, #tpu.dimension_semantics<parallel>, #tpu.dimension_semantics<arbitrary>], iteration_bounds = array<i64: 1, 1, 1>, scalar_prefetch = 0 : i64, scratch_operands = 1 : i64, tpu.core_type = #tpu.core_type<tc>, window_params = [{transform_indices = @transform_0, window_bounds = array<i64: 32, 1024>}, {transform_indices = @transform_1, window_bounds = array<i64: 1024, 128>}, {transform_indices = @transform_2, window_bounds = array<i64: 32, 128>}, {transform_indices = @transform_3, window_bounds = array<i64: 1, 1, 128>}, {transform_indices = @transform_4, window_bounds = array<i64: 1, 1, 128>}]} {
    %c0_i32 = arith.constant 0 : i32
    %0 = arith.cmpi eq, %arg2, %c0_i32 : i32
    %1 = arith.extui %0 : i1 to i32
    %c0_i32_0 = arith.constant 0 : i32
    %2 = arith.cmpi ne, %1, %c0_i32_0 : i32
    scf.if %2 {
      %cst_10 = arith.constant 0.000000e+00 : f32
      %12 = vector.broadcast %cst_10 : f32 to vector<32x128xf32>
      %c0_11 = arith.constant 0 : index
      %c0_12 = arith.constant 0 : index
      %13 = vector.load %arg8[%c0_11, %c0_12] : memref<32x128xf32, #tpu.memory_space<vmem>>, vector<32x128xf32>
      tpu.vector_store %arg8[%c0_11, %c0_12], %12 {strides = array<i32>} : memref<32x128xf32, #tpu.memory_space<vmem>>, vector<32x128xf32>,
    } else {
    }
    %c0 = arith.constant 0 : index
    %c0_1 = arith.constant 0 : index
    %3 = vector.load %arg8[%c0, %c0_1] : memref<32x128xf32, #tpu.memory_space<vmem>>, vector<32x128xf32>
    %c0_2 = arith.constant 0 : index
    %c0_3 = arith.constant 0 : index
    %4 = vector.load %arg3[%c0_2, %c0_3] : memref<32x1024xbf16, #tpu.memory_space<vmem>>, vector<32x1024xbf16>
    %c0_4 = arith.constant 0 : index
    %c0_5 = arith.constant 0 : index
    %5 = vector.load %arg4[%c0_4, %c0_5] : memref<1024x128xbf16, #tpu.memory_space<vmem>>, vector<1024x128xbf16>
    %cst = arith.constant dense<0.000000e+00> : vector<32x128xf32>
    %6 = tpu.matmul %4, %5, %cst {dimension_numbers = #tpu.dot_dimension_numbers<[1], [0], [0], [1], [0, 0, 1, 1], [], []>} : vector<32x1024xbf16>, vector<1024x128xbf16>, vector<32x128xf32> -> vector<32x128xf32>
    %7 = arith.addf %3, %6 : vector<32x128xf32>
    %c0_6 = arith.constant 0 : index
    %c0_7 = arith.constant 0 : index
    %8 = vector.load %arg8[%c0_6, %c0_7] : memref<32x128xf32, #tpu.memory_space<vmem>>, vector<32x128xf32>
    tpu.vector_store %arg8[%c0_6, %c0_7], %7 {strides = array<i32>} : memref<32x128xf32, #tpu.memory_space<vmem>>, vector<32x128xf32>,
    %c0_i32_8 = arith.constant 0 : i32
    %9 = arith.cmpi eq, %arg2, %c0_i32_8 : i32
    %10 = arith.extui %9 : i1 to i32
    %c0_i32_9 = arith.constant 0 : i32
    %11 = arith.cmpi ne, %10, %c0_i32_9 : i32
    scf.if %11 {
      %c0_10 = arith.constant 0 : index
      %c0_11 = arith.constant 0 : index
      %12 = vector.load %arg8[%c0_10, %c0_11] : memref<32x128xf32, #tpu.memory_space<vmem>>, vector<32x128xf32>
      %cst_12 = arith.constant dense<0.000000e+00> : vector<128xf32>
      %13 = vector.multi_reduction <add>, %12, %cst_12 [0] : vector<32x128xf32> to vector<128xf32>
      %14 = vector.shape_cast %13 : vector<128xf32> to vector<1x128xf32>
      %15 = vector.shape_cast %14 : vector<1x128xf32> to vector<1x1x128xf32>
      %c0_13 = arith.constant 0 : index
      %c0_14 = arith.constant 0 : index
      %c0_15 = arith.constant 0 : index
      %16 = vector.load %arg6[%c0_13, %c0_14, %c0_15] : memref<1x1x128xf32, #tpu.memory_space<vmem>>, vector<1x1x128xf32>
      tpu.vector_store %arg6[%c0_13, %c0_14, %c0_15], %15 {strides = array<i32>} : memref<1x1x128xf32, #tpu.memory_space<vmem>>, vector<1x1x128xf32>,
      %17 = arith.mulf %12, %12 : vector<32x128xf32>
      %cst_16 = arith.constant dense<0.000000e+00> : vector<128xf32>
      %18 = vector.multi_reduction <add>, %17, %cst_16 [0] : vector<32x128xf32> to vector<128xf32>
      %19 = vector.shape_cast %18 : vector<128xf32> to vector<1x128xf32>
      %20 = vector.shape_cast %19 : vector<1x128xf32> to vector<1x1x128xf32>
      %c0_17 = arith.constant 0 : index
      %c0_18 = arith.constant 0 : index
      %c0_19 = arith.constant 0 : index
      %21 = vector.load %arg7[%c0_17, %c0_18, %c0_19] : memref<1x1x128xf32, #tpu.memory_space<vmem>>, vector<1x1x128xf32>
      tpu.vector_store %arg7[%c0_17, %c0_18, %c0_19], %20 {strides = array<i32>} : memref<1x1x128xf32, #tpu.memory_space<vmem>>, vector<1x1x128xf32>,
      %22 = arith.truncf %12 : vector<32x128xf32> to vector<32x128xbf16>
      %c0_20 = arith.constant 0 : index
      %c0_21 = arith.constant 0 : index
      %23 = vector.load %arg5[%c0_20, %c0_21] : memref<32x128xbf16, #tpu.memory_space<vmem>>, vector<32x128xbf16>
      tpu.vector_store %arg5[%c0_20, %c0_21], %22 {strides = array<i32>} : memref<32x128xbf16, #tpu.memory_space<vmem>>, vector<32x128xbf16>,
    } else {
    }
    return
  }
  func.func @transform_0(%arg0: i32, %arg1: i32, %arg2: i32) -> (i32, i32) {
    %c0_i32 = arith.constant 0 : i32
    return %arg1, %arg2 : i32, i32
  }
  func.func @transform_1(%arg0: i32, %arg1: i32, %arg2: i32) -> (i32, i32) {
    %c0_i32 = arith.constant 0 : i32
    return %arg2, %arg0 : i32, i32
  }
  func.func @transform_2(%arg0: i32, %arg1: i32, %arg2: i32) -> (i32, i32) {
    %c0_i32 = arith.constant 0 : i32
    return %arg1, %arg0 : i32, i32
  }
  func.func @transform_3(%arg0: i32, %arg1: i32, %arg2: i32) -> (i32, i32, i32) {
    %c0_i32 = arith.constant 0 : i32
    %c0_i32_0 = arith.constant 0 : i32
    return %arg1, %c0_i32, %arg0 : i32, i32, i32
  }
  func.func @transform_4(%arg0: i32, %arg1: i32, %arg2: i32) -> (i32, i32, i32) {
    %c0_i32 = arith.constant 0 : i32
    %c0_i32_0 = arith.constant 0 : i32
    return %arg1, %c0_i32, %arg0 : i32, i32, i32
  }
}

module attributes {stable_mosaic.version = 11 : i64} {
  func.func @_conv_kernel(%arg0: i32, %arg1: i32, %arg2: i32, %arg3: memref<16x1024xbf16, #tpu.memory_space<vmem>>, %arg4: memref<1024x128xbf16, #tpu.memory_space<vmem>>, %arg5: memref<1x128xf32, #tpu.memory_space<vmem>>, %arg6: memref<16x128xf32, #tpu.memory_space<vmem>>) attributes {dimension_semantics = [#tpu.dimension_semantics<parallel>, #tpu.dimension_semantics<parallel>, #tpu.dimension_semantics<arbitrary>], iteration_bounds = array<i64: 1, 1, 2>, scalar_prefetch = 0 : i64, scratch_operands = 0 : i64, tpu.core_type = #tpu.core_type<tc>, window_params = [{transform_indices = @transform_0, window_bounds = array<i64: 16, 1024>}, {transform_indices = @transform_1, window_bounds = array<i64: 1024, 128>}, {transform_indices = @transform_2, window_bounds = array<i64: 1, 128>}, {transform_indices = @transform_3, window_bounds = array<i64: 16, 128>}]} {
    %c0_i32 = arith.constant 0 : i32
    %0 = arith.cmpi eq, %arg2, %c0_i32 : i32
    %1 = arith.extui %0 : i1 to i32
    %c0_i32_0 = arith.constant 0 : i32
    %2 = arith.cmpi ne, %1, %c0_i32_0 : i32
    scf.if %2 {
      %cst_9 = arith.constant 0.000000e+00 : f32
      %12 = vector.broadcast %cst_9 : f32 to vector<16x128xf32>
      %c0_10 = arith.constant 0 : index
      %c0_11 = arith.constant 0 : index
      %13 = vector.load %arg6[%c0_10, %c0_11] : memref<16x128xf32, #tpu.memory_space<vmem>>, vector<16x128xf32>
      tpu.vector_store %arg6[%c0_10, %c0_11], %12 {strides = array<i32>} : memref<16x128xf32, #tpu.memory_space<vmem>>, vector<16x128xf32>,
    } else {
    }
    %c0 = arith.constant 0 : index
    %c0_1 = arith.constant 0 : index
    %3 = vector.load %arg6[%c0, %c0_1] : memref<16x128xf32, #tpu.memory_space<vmem>>, vector<16x128xf32>
    %c0_2 = arith.constant 0 : index
    %c0_3 = arith.constant 0 : index
    %4 = vector.load %arg3[%c0_2, %c0_3] : memref<16x1024xbf16, #tpu.memory_space<vmem>>, vector<16x1024xbf16>
    %c0_4 = arith.constant 0 : index
    %c0_5 = arith.constant 0 : index
    %5 = vector.load %arg4[%c0_4, %c0_5] : memref<1024x128xbf16, #tpu.memory_space<vmem>>, vector<1024x128xbf16>
    %cst = arith.constant dense<0.000000e+00> : vector<16x128xf32>
    %6 = tpu.matmul %4, %5, %cst {dimension_numbers = #tpu.dot_dimension_numbers<[1], [0], [0], [1], [0, 0, 1, 1], [], []>} : vector<16x1024xbf16>, vector<1024x128xbf16>, vector<16x128xf32> -> vector<16x128xf32>
    %7 = arith.addf %3, %6 : vector<16x128xf32>
    %c0_6 = arith.constant 0 : index
    %c0_7 = arith.constant 0 : index
    %8 = vector.load %arg6[%c0_6, %c0_7] : memref<16x128xf32, #tpu.memory_space<vmem>>, vector<16x128xf32>
    tpu.vector_store %arg6[%c0_6, %c0_7], %7 {strides = array<i32>} : memref<16x128xf32, #tpu.memory_space<vmem>>, vector<16x128xf32>,
    %c1_i32 = arith.constant 1 : i32
    %9 = arith.cmpi eq, %arg2, %c1_i32 : i32
    %10 = arith.extui %9 : i1 to i32
    %c0_i32_8 = arith.constant 0 : i32
    %11 = arith.cmpi ne, %10, %c0_i32_8 : i32
    scf.if %11 {
      %c0_9 = arith.constant 0 : index
      %c0_10 = arith.constant 0 : index
      %12 = vector.load %arg6[%c0_9, %c0_10] : memref<16x128xf32, #tpu.memory_space<vmem>>, vector<16x128xf32>
      %c0_11 = arith.constant 0 : index
      %c0_12 = arith.constant 0 : index
      %13 = vector.load %arg5[%c0_11, %c0_12] : memref<1x128xf32, #tpu.memory_space<vmem>>, vector<1x128xf32>
      %14 = vector.broadcast %13 : vector<1x128xf32> to vector<16x128xf32>
      %15 = arith.addf %12, %14 : vector<16x128xf32>
      %c0_13 = arith.constant 0 : index
      %c0_14 = arith.constant 0 : index
      %16 = vector.load %arg6[%c0_13, %c0_14] : memref<16x128xf32, #tpu.memory_space<vmem>>, vector<16x128xf32>
      tpu.vector_store %arg6[%c0_13, %c0_14], %15 {strides = array<i32>} : memref<16x128xf32, #tpu.memory_space<vmem>>, vector<16x128xf32>,
    } else {
    }
    return
  }
  func.func @transform_0(%arg0: i32, %arg1: i32, %arg2: i32) -> (i32, i32) {
    %c0_i32 = arith.constant 0 : i32
    return %arg1, %arg2 : i32, i32
  }
  func.func @transform_1(%arg0: i32, %arg1: i32, %arg2: i32) -> (i32, i32) {
    %c0_i32 = arith.constant 0 : i32
    return %arg2, %arg0 : i32, i32
  }
  func.func @transform_2(%arg0: i32, %arg1: i32, %arg2: i32) -> (i32, i32) {
    %c0_i32 = arith.constant 0 : i32
    %c0_i32_0 = arith.constant 0 : i32
    return %c0_i32, %arg0 : i32, i32
  }
  func.func @transform_3(%arg0: i32, %arg1: i32, %arg2: i32) -> (i32, i32) {
    %c0_i32 = arith.constant 0 : i32
    return %arg1, %arg0 : i32, i32
  }
}

</mosaic_0001>

<bundles_post_ra>
// kernel: patchgan_forward.5
= control target key start
LH: loop header
LB: loop body
LE: loop exit
PB: predicated region body
PF: predicated region fallthrough
CT: control target
= control target key end

     0   :  { %v2275_v0 = vmov 0   ;;  %s2733_s1 = inlined_call_operand.vmem [shape: bf16[256,128], index: 1, kind: input, shape index: {}]   ;;  %s2734_s0 = inlined_call_operand.vmem [shape: bf16[512,256], index: 0, kind: input, shape index: {}]   ;;  %s2735_s2 = inlined_call_operand.vmem [shape: f32[1,128], index: 2, kind: input, shape index: {}]   ;;  %s2736_s3 = inlined_call_operand.vmem [shape: bf16[512,128], index: 3, kind: output, shape index: {}]  }
   0x1   :  { %659 = vmatprep.subr.bf16.mxu0 %v2275_v0  ;;  %2130 = vmatprep.subr.bf16.mxu1 %v2275_v0  ;;  %v2163_v1 = vld [vmem:[%s2733_s1] sm:$0xff]   ;;  %v2164_v2 = vld [vmem:[%s2733_s1 + $0x8] sm:$0xff]   ;;  %v2165_v3 = vld [vmem:[%s2733_s1 + $0x10] sm:$0xff]  }
   0x2   :  { %660 = vmatpush1.bf16.msra.mxu0 %v2163_v1  ;;  %2146 = vmatpush1.bf16.msra.mxu1 %v2163_v1  ;;  %v2166_v4 = vld [vmem:[%s2733_s1 + $0x18] sm:$0xff]   ;;  %v2167_v5 = vld [vmem:[%s2733_s1 + $0x20] sm:$0xff]   ;;  %v2168_v7 = vld [vmem:[%s2733_s1 + $0x28] sm:$0xff]  }
   0x3   :  { %661 = vmatprep.subr.bf16.mxu0 %v2275_v0  ;;  %2131 = vmatprep.subr.bf16.mxu1 %v2275_v0  ;;  %v2181_v6 = vld [vmem:[%s2734_s0 + $0x4] ss:$8 sps:$4 sm:$0xff]   ;;  %v2169_v9 = vld [vmem:[%s2733_s1 + $0x30] sm:$0xff]   ;;  %v2170_v10 = vld [vmem:[%s2733_s1 + $0x38] sm:$0xff]  }
   0x4   :  { %v2184_v8 = vld [vmem:[%s2734_s0 + $0x104] ss:$8 sps:$4 sm:$0xff]   ;;  %691 = vmatprep.mubr.bf16.mxu0 %v2181_v6  ;;  %v2173_v13 = vld [vmem:[%s2733_s1 + $0x50] sm:$0xff]   ;;  %v2174_v14 = vld [vmem:[%s2733_s1 + $0x58] sm:$0xff]  }
   0x5   :  { %819 = vmatprep.mubr.bf16.mxu1 %v2184_v8  ;;  %v2171_v11 = vld [vmem:[%s2733_s1 + $0x40] sm:$0xff]   ;;  %v2172_v12 = vld [vmem:[%s2733_s1 + $0x48] sm:$0xff]   ;;  %v2177_v17 = vld [vmem:[%s2733_s1 + $0x70] sm:$0xff]  }
   0x6   :  { %662 = vmatpush1.bf16.msra.mxu0 %v2164_v2  ;;  %2147 = vmatpush1.bf16.msra.mxu1 %v2164_v2  ;;  %v2175_v15 = vld [vmem:[%s2733_s1 + $0x60] sm:$0xff]   ;;  %v2176_v16 = vld [vmem:[%s2733_s1 + $0x68] sm:$0xff]   ;;  %v2178_v18 = vld [vmem:[%s2733_s1 + $0x78] sm:$0xff]  }
   0x7   :  { %663 = vmatprep.subr.bf16.mxu0 %v2275_v0  ;;  %2132 = vmatprep.subr.bf16.mxu1 %v2275_v0  ;;  %v2179_v19 = vld [vmem:[%s2734_s0] ss:$8 sps:$4 sm:$0xff]   ;;  %v2185_v21 = vld [vmem:[%s2734_s0 + $0x14] ss:$8 sps:$4 sm:$0xff]   ;;  %v2189_v23 = vld [vmem:[%s2734_s0 + $0x10] ss:$8 sps:$4 sm:$0xff]  }
   0x8   :  { %v2182_v20 = vld [vmem:[%s2734_s0 + $0x100] ss:$8 sps:$4 sm:$0xff]   ;;  %v2187_v22 = vld [vmem:[%s2734_s0 + $0x114] ss:$8 sps:$4 sm:$0xff]   ;;  %v2190_v24 = vld [vmem:[%s2734_s0 + $0x110] ss:$8 sps:$4 sm:$0xff]  }
   0x9   :  { %v2191_v25 = vld [vmem:[%s2734_s0 + $0x24] ss:$8 sps:$4 sm:$0xff]   ;;  %v2195_v27 = vld [vmem:[%s2734_s0 + $0x20] ss:$8 sps:$4 sm:$0xff]   ;;  %v2197_v29 = vld [vmem:[%s2734_s0 + $0x34] ss:$8 sps:$4 sm:$0xff]  }
   0xa   :  { %664 = vmatpush1.bf16.msra.mxu0 %v2165_v3  ;;  %2148 = vmatpush1.bf16.msra.mxu1 %v2165_v3  ;;  %v2193_v26 = vld [vmem:[%s2734_s0 + $0x124] ss:$8 sps:$4 sm:$0xff]   ;;  %v2196_v28 = vld [vmem:[%s2734_s0 + $0x120] ss:$8 sps:$4 sm:$0xff]   ;;  %v2199_v30 = vld [vmem:[%s2734_s0 + $0x134] ss:$8 sps:$4 sm:$0xff]  }
   0xb   :  { %665 = vmatprep.subr.bf16.mxu0 %v2275_v0  ;;  %2133 = vmatprep.subr.bf16.mxu1 %v2275_v0  ;;  %v2201_v31 = vld [vmem:[%s2734_s0 + $0x30] ss:$8 sps:$4 sm:$0xff]   ;;  %v2203_v33 = vld [vmem:[%s2734_s0 + $0x44] ss:$8 sps:$4 sm:$0xff]   ;;  %v2207_v35 = vld [vmem:[%s2734_s0 + $0x40] ss:$8 sps:$4 sm:$0xff]  }
   0xc   :  { %v2202_v32 = vld [vmem:[%s2734_s0 + $0x130] ss:$8 sps:$4 sm:$0xff]   ;;  %v2205_v34 = vld [vmem:[%s2734_s0 + $0x144] ss:$8 sps:$4 sm:$0xff]   ;;  %v2208_v36 = vld [vmem:[%s2734_s0 + $0x140] ss:$8 sps:$4 sm:$0xff]  }
   0xd   :  { %v2209_v37 = vld [vmem:[%s2734_s0 + $0x54] ss:$8 sps:$4 sm:$0xff]   ;;  %v2213_v39 = vld [vmem:[%s2734_s0 + $0x50] ss:$8 sps:$4 sm:$0xff]   ;;  %v2215_v41 = vld [vmem:[%s2734_s0 + $0x64] ss:$8 sps:$4 sm:$0xff]  }
   0xe   :  { %666 = vmatpush1.bf16.msra.mxu0 %v2166_v4  ;;  %2149 = vmatpush1.bf16.msra.mxu1 %v2166_v4  ;;  %v2211_v38 = vld [vmem:[%s2734_s0 + $0x154] ss:$8 sps:$4 sm:$0xff]   ;;  %v2214_v40 = vld [vmem:[%s2734_s0 + $0x150] ss:$8 sps:$4 sm:$0xff]   ;;  %v2217_v42 = vld [vmem:[%s2734_s0 + $0x164] ss:$8 sps:$4 sm:$0xff]  }
   0xf   :  { %667 = vmatprep.subr.bf16.mxu0 %v2275_v0  ;;  %2134 = vmatprep.subr.bf16.mxu1 %v2275_v0  ;;  %v2219_v43 = vld [vmem:[%s2734_s0 + $0x60] ss:$8 sps:$4 sm:$0xff]   ;;  %v2221_v45 = vld [vmem:[%s2734_s0 + $0x74] ss:$8 sps:$4 sm:$0xff]   ;;  %v2225_v47 = vld [vmem:[%s2734_s0 + $0x70] ss:$8 sps:$4 sm:$0xff]  }
  0x10   :  { %v2220_v44 = vld [vmem:[%s2734_s0 + $0x160] ss:$8 sps:$4 sm:$0xff]   ;;  %v2223_v46 = vld [vmem:[%s2734_s0 + $0x174] ss:$8 sps:$4 sm:$0xff]   ;;  %v2226_v48 = vld [vmem:[%s2734_s0 + $0x170] ss:$8 sps:$4 sm:$0xff]  }
  0x11   :  { %v2227_v49 = vld [vmem:[%s2734_s0 + $0x84] ss:$8 sps:$4 sm:$0xff]   ;;  %v2231_v51 = vld [vmem:[%s2734_s0 + $0x80] ss:$8 sps:$4 sm:$0xff]   ;;  %v2233_v53 = vld [vmem:[%s2734_s0 + $0x94] ss:$8 sps:$4 sm:$0xff]  }
  0x12   :  { %668 = vmatpush1.bf16.msra.mxu0 %v2167_v5  ;;  %2150 = vmatpush1.bf16.msra.mxu1 %v2167_v5  ;;  %v2229_v50 = vld [vmem:[%s2734_s0 + $0x184] ss:$8 sps:$4 sm:$0xff]   ;;  %v2232_v52 = vld [vmem:[%s2734_s0 + $0x180] ss:$8 sps:$4 sm:$0xff]   ;;  %v2235_v54 = vld [vmem:[%s2734_s0 + $0x194] ss:$8 sps:$4 sm:$0xff]  }
  0x13   :  { %669 = vmatprep.subr.bf16.mxu0 %v2275_v0  ;;  %2135 = vmatprep.subr.bf16.mxu1 %v2275_v0  ;;  %v2237_v55 = vld [vmem:[%s2734_s0 + $0x90] ss:$8 sps:$4 sm:$0xff]   ;;  %v2239_v57 = vld [vmem:[%s2734_s0 + $0xa4] ss:$8 sps:$4 sm:$0xff]   ;;  %v2243_v59 = vld [vmem:[%s2734_s0 + $0xa0] ss:$8 sps:$4 sm:$0xff]  }
  0x14   :  { %v2238_v56 = vld [vmem:[%s2734_s0 + $0x190] ss:$8 sps:$4 sm:$0xff]   ;;  %v2241_v58 = vld [vmem:[%s2734_s0 + $0x1a4] ss:$8 sps:$4 sm:$0xff]   ;;  %v2244_v60 = vld [vmem:[%s2734_s0 + $0x1a0] ss:$8 sps:$4 sm:$0xff]  }
  0x15   :  { %v2245_v61 = vld [vmem:[%s2734_s0 + $0xb4] ss:$8 sps:$4 sm:$0xff]   ;;  %v2249_v63 = vld [vmem:[%s2734_s0 + $0xb0] ss:$8 sps:$4 sm:$0xff]   ;;  %v2251_v1 = vld [vmem:[%s2734_s0 + $0xc4] ss:$8 sps:$4 sm:$0xff]  }
  0x16   :  { %670 = vmatpush1.bf16.msra.mxu0 %v2168_v7  ;;  %2151 = vmatpush1.bf16.msra.mxu1 %v2168_v7  ;;  %v2247_v62 = vld [vmem:[%s2734_s0 + $0x1b4] ss:$8 sps:$4 sm:$0xff]   ;;  %v2253_v2 = vld [vmem:[%s2734_s0 + $0x1c4] ss:$8 sps:$4 sm:$0xff]   ;;  %v2255_v3 = vld [vmem:[%s2734_s0 + $0xc0] ss:$8 sps:$4 sm:$0xff]  }
  0x17   :  { %671 = vmatprep.subr.bf16.mxu0 %v2275_v0  ;;  %2136 = vmatprep.subr.bf16.mxu1 %v2275_v0  ;;  %v2256_v4 = vld [vmem:[%s2734_s0 + $0x1c0] ss:$8 sps:$4 sm:$0xff]   ;;  %v2257_v5 = vld [vmem:[%s2734_s0 + $0xd4] ss:$8 sps:$4 sm:$0xff]   ;;  %v2261_v7 = vld [vmem:[%s2734_s0 + $0xd0] ss:$8 sps:$4 sm:$0xff]  }
  0x18   :  { %v2259_v6 = vld [vmem:[%s2734_s0 + $0x1d4] ss:$8 sps:$4 sm:$0xff]   ;;  %v2262_v8 = vld [vmem:[%s2734_s0 + $0x1d0] ss:$8 sps:$4 sm:$0xff]  }
  0x1a   :  { %672 = vmatpush1.bf16.msra.mxu0 %v2169_v9  ;;  %2152 = vmatpush1.bf16.msra.mxu1 %v2169_v9  ;;  %v2263_v9 = vld [vmem:[%s2734_s0 + $0xe4] ss:$8 sps:$4 sm:$0xff]  }
  0x1b   :  { %673 = vmatprep.subr.bf16.mxu0 %v2275_v0  ;;  %2137 = vmatprep.subr.bf16.mxu1 %v2275_v0 }
  0x1e   :  { %674 = vmatpush1.bf16.msra.mxu0 %v2170_v10  ;;  %2153 = vmatpush1.bf16.msra.mxu1 %v2170_v10  ;;  %v2265_v10 = vld [vmem:[%s2734_s0 + $0x1e4] ss:$8 sps:$4 sm:$0xff]  }
  0x1f   :  { %675 = vmatprep.subr.bf16.mxu0 %v2275_v0  ;;  %2138 = vmatprep.subr.bf16.mxu1 %v2275_v0 }
  0x22   :  { %676 = vmatpush1.bf16.msra.mxu0 %v2171_v11  ;;  %2154 = vmatpush1.bf16.msra.mxu1 %v2171_v11  ;;  %v2267_v11 = vld [vmem:[%s2734_s0 + $0xe0] ss:$8 sps:$4 sm:$0xff]  }
  0x23   :  { %677 = vmatprep.subr.bf16.mxu0 %v2275_v0  ;;  %2139 = vmatprep.subr.bf16.mxu1 %v2275_v0 }
  0x26   :  { %678 = vmatpush1.bf16.msra.mxu0 %v2172_v12  ;;  %2155 = vmatpush1.bf16.msra.mxu1 %v2172_v12  ;;  %v2268_v12 = vld [vmem:[%s2734_s0 + $0x1e0] ss:$8 sps:$4 sm:$0xff]  }
  0x27   :  { %679 = vmatprep.subr.bf16.mxu0 %v2275_v0  ;;  %2140 = vmatprep.subr.bf16.mxu1 %v2275_v0 }
  0x2a   :  { %680 = vmatpush1.bf16.msra.mxu0 %v2173_v13  ;;  %2156 = vmatpush1.bf16.msra.mxu1 %v2173_v13  ;;  %v2269_v13 = vld [vmem:[%s2734_s0 + $0xf4] ss:$8 sps:$4 sm:$0xff]  }
  0x2b   :  { %681 = vmatprep.subr.bf16.mxu0 %v2275_v0  ;;  %2141 = vmatprep.subr.bf16.mxu1 %v2275_v0 }
  0x2e   :  { %682 = vmatpush1.bf16.msra.mxu0 %v2174_v14  ;;  %2157 = vmatpush1.bf16.msra.mxu1 %v2174_v14  ;;  %v2271_v14 = vld [vmem:[%s2734_s0 + $0x1f4] ss:$8 sps:$4 sm:$0xff]  }
  0x2f   :  { %683 = vmatprep.subr.bf16.mxu0 %v2275_v0  ;;  %2142 = vmatprep.subr.bf16.mxu1 %v2275_v0 }
  0x32   :  { %684 = vmatpush1.bf16.msra.mxu0 %v2175_v15  ;;  %2158 = vmatpush1.bf16.msra.mxu1 %v2175_v15  ;;  %v2273_v15 = vld [vmem:[%s2734_s0 + $0xf0] ss:$8 sps:$4 sm:$0xff]  }
  0x33   :  { %685 = vmatprep.subr.bf16.mxu0 %v2275_v0  ;;  %2143 = vmatprep.subr.bf16.mxu1 %v2275_v0 }
  0x36   :  { %686 = vmatpush1.bf16.msra.mxu0 %v2176_v16  ;;  %2159 = vmatpush1.bf16.msra.mxu1 %v2176_v16  ;;  %v2274_v16 = vld [vmem:[%s2734_s0 + $0x1f0] ss:$8 sps:$4 sm:$0xff]  }
  0x37   :  { %687 = vmatprep.subr.bf16.mxu0 %v2275_v0  ;;  %2144 = vmatprep.subr.bf16.mxu1 %v2275_v0 }
  0x3a   :  { %688 = vmatpush1.bf16.msra.mxu0 %v2177_v17  ;;  %2160 = vmatpush1.bf16.msra.mxu1 %v2177_v17  ;;  %v2571_v17 = vld [vmem:[%s2735_s2] ss:$0 sm:$0xff] }
  0x3b   :  { %689 = vmatprep.subr.bf16.mxu0 %v2275_v0  ;;  %2145 = vmatprep.subr.bf16.mxu1 %v2275_v0  ;;  %v2250_v0 = vld [vmem:[%s2734_s0 + $0x1b0] ss:$8 sps:$4 sm:$0xff]  }
  0x3e   :  { %690 = vmatpush1.bf16.msra.mxu0 %v2178_v18  ;;  %2161 = vmatpush1.bf16.msra.mxu1 %v2178_v18 }
  0x41   :  { %692 = vmatmul.mubr.bf16.vlgmr.msra.gmra.mrb[0].mxu0 %v2179_v19  ;;  %820 = vmatmul.mubr.bf16.vlgmr.msra.gmra.mrb[0].mxu1 %v2182_v20 }
  0x42   :  { %699 = vmatprep.mubr.bf16.mxu0 %v2185_v21  ;;  %827 = vmatprep.mubr.bf16.mxu1 %v2187_v22 }
  0x49   :  { %700 = vmatmul.mubr.bf16.gmra.mrb[4].mxu0 %v2189_v23  ;;  %828 = vmatmul.mubr.bf16.gmra.mrb[4].mxu1 %v2190_v24 }
  0x4a   :  { %707 = vmatprep.mubr.bf16.mxu0 %v2191_v25  ;;  %835 = vmatprep.mubr.bf16.mxu1 %v2193_v26 }
  0x51   :  { %708 = vmatmul.mubr.bf16.gmra.mrb[8].mxu0 %v2195_v27  ;;  %836 = vmatmul.mubr.bf16.gmra.mrb[8].mxu1 %v2196_v28 }
  0x52   :  { %715 = vmatprep.mubr.bf16.mxu0 %v2197_v29  ;;  %843 = vmatprep.mubr.bf16.mxu1 %v2199_v30 }
  0x59   :  { %716 = vmatmul.mubr.bf16.gmra.mrb[12].mxu0 %v2201_v31  ;;  %844 = vmatmul.mubr.bf16.gmra.mrb[12].mxu1 %v2202_v32 }
  0x5a   :  { %723 = vmatprep.mubr.bf16.mxu0 %v2203_v33  ;;  %851 = vmatprep.mubr.bf16.mxu1 %v2205_v34 }
  0x61   :  { %724 = vmatmul.mubr.bf16.gmra.mrb[16].mxu0 %v2207_v35  ;;  %852 = vmatmul.mubr.bf16.gmra.mrb[16].mxu1 %v2208_v36 }
  0x62   :  { %731 = vmatprep.mubr.bf16.mxu0 %v2209_v37  ;;  %859 = vmatprep.mubr.bf16.mxu1 %v2211_v38 }
  0x69   :  { %732 = vmatmul.mubr.bf16.gmra.mrb[20].mxu0 %v2213_v39  ;;  %860 = vmatmul.mubr.bf16.gmra.mrb[20].mxu1 %v2214_v40 }
  0x6a   :  { %739 = vmatprep.mubr.bf16.mxu0 %v2215_v41  ;;  %867 = vmatprep.mubr.bf16.mxu1 %v2217_v42 }
  0x71   :  { %740 = vmatmul.mubr.bf16.gmra.mrb[24].mxu0 %v2219_v43  ;;  %868 = vmatmul.mubr.bf16.gmra.mrb[24].mxu1 %v2220_v44 }
  0x72   :  { %747 = vmatprep.mubr.bf16.mxu0 %v2221_v45  ;;  %875 = vmatprep.mubr.bf16.mxu1 %v2223_v46 }
  0x79   :  { %748 = vmatmul.mubr.bf16.gmra.mrb[28].mxu0 %v2225_v47  ;;  %876 = vmatmul.mubr.bf16.gmra.mrb[28].mxu1 %v2226_v48 }
  0x7a   :  { %755 = vmatprep.mubr.bf16.mxu0 %v2227_v49  ;;  %883 = vmatprep.mubr.bf16.mxu1 %v2229_v50 }
  0x81   :  { %756 = vmatmul.mubr.bf16.gmra.mrb[32].mxu0 %v2231_v51  ;;  %884 = vmatmul.mubr.bf16.gmra.mrb[32].mxu1 %v2232_v52 }
  0x82   :  { %763 = vmatprep.mubr.bf16.mxu0 %v2233_v53  ;;  %891 = vmatprep.mubr.bf16.mxu1 %v2235_v54 }
  0x89   :  { %764 = vmatmul.mubr.bf16.gmra.mrb[36].mxu0 %v2237_v55  ;;  %892 = vmatmul.mubr.bf16.gmra.mrb[36].mxu1 %v2238_v56 }
  0x8a   :  { %771 = vmatprep.mubr.bf16.mxu0 %v2239_v57  ;;  %899 = vmatprep.mubr.bf16.mxu1 %v2241_v58 }
  0x91   :  { %772 = vmatmul.mubr.bf16.gmra.mrb[40].mxu0 %v2243_v59  ;;  %900 = vmatmul.mubr.bf16.gmra.mrb[40].mxu1 %v2244_v60 }
  0x92   :  { %779 = vmatprep.mubr.bf16.mxu0 %v2245_v61  ;;  %907 = vmatprep.mubr.bf16.mxu1 %v2247_v62 }
  0x99   :  { %780 = vmatmul.mubr.bf16.gmra.mrb[44].mxu0 %v2249_v63  ;;  %908 = vmatmul.mubr.bf16.gmra.mrb[44].mxu1 %v2250_v0 }
  0x9a   :  { %787 = vmatprep.mubr.bf16.mxu0 %v2251_v1  ;;  %915 = vmatprep.mubr.bf16.mxu1 %v2253_v2 }
  0xa1   :  { %788 = vmatmul.mubr.bf16.gmra.mrb[48].mxu0 %v2255_v3  ;;  %916 = vmatmul.mubr.bf16.gmra.mrb[48].mxu1 %v2256_v4 }
  0xa2   :  { %795 = vmatprep.mubr.bf16.mxu0 %v2257_v5  ;;  %923 = vmatprep.mubr.bf16.mxu1 %v2259_v6 }
  0xa9   :  { %796 = vmatmul.mubr.bf16.gmra.mrb[52].mxu0 %v2261_v7  ;;  %924 = vmatmul.mubr.bf16.gmra.mrb[52].mxu1 %v2262_v8 }
  0xaa   :  { %803 = vmatprep.mubr.bf16.mxu0 %v2263_v9  ;;  %931 = vmatprep.mubr.bf16.mxu1 %v2265_v10 }
  0xb1   :  { %804 = vmatmul.mubr.bf16.gmra.mrb[56].mxu0 %v2267_v11  ;;  %932 = vmatmul.mubr.bf16.gmra.mrb[56].mxu1 %v2268_v12 }
  0xb2   :  { %811 = vmatprep.mubr.bf16.mxu0 %v2269_v13  ;;  %939 = vmatprep.mubr.bf16.mxu1 %v2271_v14 }
  0xb9   :  { %812 = vmatmul.mubr.bf16.gmra.mrb[60].mxu0 %v2273_v15  ;;  %940 = vmatmul.mubr.bf16.gmra.mrb[60].mxu1 %v2274_v16 }
 0x114   :  { %v693_v18 = vpop.f32.mrb[0].mxu0  ;;  %v821_v19 = vpop.f32.mrb[0].mxu1 }
 0x115   :  { %v1150_v20 = vadd.f32 %v2571_v17, %v693_v18  ;;  %v1182_v21 = vadd.f32 %v2571_v17, %v821_v19  ;;  %v695_v22 = vpop.f32.mrb[1].mxu0  ;;  %v823_v23 = vpop.f32.mrb[1].mxu1 }
 0x116   :  { %v696_v24 = vpop.f32.mrb[2].mxu0  ;;  %v824_v25 = vpop.f32.mrb[2].mxu1 }
 0x117   :  { %v1278_v26 = vmul.f32 0.2, %v1150_v20  ;;  %v1310_v27 = vmul.f32 0.2, %v1182_v21  ;;  %v1151_v28 = vadd.f32 %v2571_v17, %v696_v24  ;;  %v1183_v29 = vadd.f32 %v2571_v17, %v824_v25  ;;  %v698_v30 = vpop.f32.mrb[3].mxu0  ;;  %v826_v31 = vpop.f32.mrb[3].mxu1 }
 0x118   :  { %vm1214_vm0 = vcmp.ge.f32.partialorder %v1150_v20, 0.0  ;;  %vm1246_vm1 = vcmp.ge.f32.partialorder %v1182_v21, 0.0 }
 0x119   :  { %vm1215_vm2 = vcmp.ge.f32.partialorder %v1151_v28, 0.0  ;;  %v1279_v32 = vmul.f32 0.2, %v1151_v28  ;;  %vm1247_vm3 = vcmp.ge.f32.partialorder %v1183_v29, 0.0  ;;  %v1311_v33 = vmul.f32 0.2, %v1183_v29 }
 0x11a   :  { %v1342_v34 = vsel %vm1214_vm0, %v1150_v20, %v1278_v26  ;;  %v1374_v35 = vsel %vm1246_vm1, %v1182_v21, %v1310_v27 }
 0x11b   :  { %v1343_v36 = vsel %vm1215_vm2, %v1151_v28, %v1279_v32  ;;  %v1375_v37 = vsel %vm1247_vm3, %v1183_v29, %v1311_v33 }
 0x11c   :  { %v701_v38 = vpop.f32.mrb[4].mxu0  ;;  %v829_v39 = vpop.f32.mrb[4].mxu1  ;;  %v1942_v40 = vpack.c.bf16 %v1343_v36, %v1342_v34  ;;  %v2022_v41 = vpack.c.bf16 %v1375_v37, %v1374_v35 }
 0x11d   :  { %v1152_v42 = vadd.f32 %v2571_v17, %v701_v38  ;;  %v1184_v43 = vadd.f32 %v2571_v17, %v829_v39  ;;  %v703_v44 = vpop.f32.mrb[5].mxu0  ;;  %v831_v45 = vpop.f32.mrb[5].mxu1 }
 0x11e   :  { %v704_v46 = vpop.f32.mrb[6].mxu0  ;;  %v832_v47 = vpop.f32.mrb[6].mxu1  ;;  %1943 = vst [vmem:[%s2736_s3] sm:$0xff] %v1942_v40   ;;  %2114 = vst [vmem:[%s2736_s3 + $0x80] sm:$0xff] %v2022_v41  }
 0x11f   :  { %v1280_v48 = vmul.f32 0.2, %v1152_v42  ;;  %v1312_v49 = vmul.f32 0.2, %v1184_v43  ;;  %v1153_v50 = vadd.f32 %v2571_v17, %v704_v46  ;;  %v1185_v51 = vadd.f32 %v2571_v17, %v832_v47  ;;  %v706_v52 = vpop.f32.mrb[7].mxu0  ;;  %v834_v53 = vpop.f32.mrb[7].mxu1 }
 0x120   :  { %vm1216_vm4 = vcmp.ge.f32.partialorder %v1152_v42, 0.0  ;;  %vm1248_vm5 = vcmp.ge.f32.partialorder %v1184_v43, 0.0 }
 0x121   :  { %vm1217_vm6 = vcmp.ge.f32.partialorder %v1153_v50, 0.0  ;;  %v1281_v54 = vmul.f32 0.2, %v1153_v50  ;;  %vm1249_vm7 = vcmp.ge.f32.partialorder %v1185_v51, 0.0  ;;  %v1313_v55 = vmul.f32 0.2, %v1185_v51 }
 0x122   :  { %v1344_v56 = vsel %vm1216_vm4, %v1152_v42, %v1280_v48  ;;  %v1376_v57 = vsel %vm1248_vm5, %v1184_v43, %v1312_v49 }
 0x123   :  { %v1345_v58 = vsel %vm1217_vm6, %v1153_v50, %v1281_v54  ;;  %v1377_v59 = vsel %vm1249_vm7, %v1185_v51, %v1313_v55 }
 0x124   :  { %v709_v60 = vpop.f32.mrb[8].mxu0  ;;  %v837_v61 = vpop.f32.mrb[8].mxu1  ;;  %v1947_v62 = vpack.c.bf16 %v1345_v58, %v1344_v56  ;;  %v2027_v63 = vpack.c.bf16 %v1377_v59, %v1376_v57 }
 0x125   :  { %v1154_v0 = vadd.f32 %v2571_v17, %v709_v60  ;;  %v1186_v1 = vadd.f32 %v2571_v17, %v837_v61  ;;  %v711_v2 = vpop.f32.mrb[9].mxu0  ;;  %v839_v3 = vpop.f32.mrb[9].mxu1 }
 0x126   :  { %v712_v4 = vpop.f32.mrb[10].mxu0  ;;  %v840_v5 = vpop.f32.mrb[10].mxu1  ;;  %2099 = vst [vmem:[%s2736_s3 + $0x8] sm:$0xff] %v1947_v62   ;;  %2115 = vst [vmem:[%s2736_s3 + $0x88] sm:$0xff] %v2027_v63  }
 0x127   :  { %v1282_v6 = vmul.f32 0.2, %v1154_v0  ;;  %v1314_v7 = vmul.f32 0.2, %v1186_v1  ;;  %v1155_v8 = vadd.f32 %v2571_v17, %v712_v4  ;;  %v1187_v9 = vadd.f32 %v2571_v17, %v840_v5  ;;  %v714_v10 = vpop.f32.mrb[11].mxu0  ;;  %v842_v11 = vpop.f32.mrb[11].mxu1 }
 0x128   :  { %vm1218_vm8 = vcmp.ge.f32.partialorder %v1154_v0, 0.0  ;;  %vm1250_vm9 = vcmp.ge.f32.partialorder %v1186_v1, 0.0 }
 0x129   :  { %vm1219_vm10 = vcmp.ge.f32.partialorder %v1155_v8, 0.0  ;;  %v1283_v12 = vmul.f32 0.2, %v1155_v8  ;;  %vm1251_vm11 = vcmp.ge.f32.partialorder %v1187_v9, 0.0  ;;  %v1315_v13 = vmul.f32 0.2, %v1187_v9 }
 0x12a   :  { %v1346_v14 = vsel %vm1218_vm8, %v1154_v0, %v1282_v6  ;;  %v1378_v15 = vsel %vm1250_vm9, %v1186_v1, %v1314_v7 }
 0x12b   :  { %v1347_v16 = vsel %vm1219_vm10, %v1155_v8, %v1283_v12  ;;  %v1379_v18 = vsel %vm1251_vm11, %v1187_v9, %v1315_v13 }
 0x12c   :  { %v717_v19 = vpop.f32.mrb[12].mxu0  ;;  %v845_v20 = vpop.f32.mrb[12].mxu1  ;;  %v1952_v21 = vpack.c.bf16 %v1347_v16, %v1346_v14  ;;  %v2032_v22 = vpack.c.bf16 %v1379_v18, %v1378_v15 }
 0x12d   :  { %v1156_v23 = vadd.f32 %v2571_v17, %v717_v19  ;;  %v1188_v24 = vadd.f32 %v2571_v17, %v845_v20  ;;  %v719_v25 = vpop.f32.mrb[13].mxu0  ;;  %v847_v26 = vpop.f32.mrb[13].mxu1 }
 0x12e   :  { %v720_v27 = vpop.f32.mrb[14].mxu0  ;;  %v848_v28 = vpop.f32.mrb[14].mxu1  ;;  %2100 = vst [vmem:[%s2736_s3 + $0x10] sm:$0xff] %v1952_v21   ;;  %2116 = vst [vmem:[%s2736_s3 + $0x90] sm:$0xff] %v2032_v22  }
 0x12f   :  { %v1284_v29 = vmul.f32 0.2, %v1156_v23  ;;  %v1316_v30 = vmul.f32 0.2, %v1188_v24  ;;  %v1157_v31 = vadd.f32 %v2571_v17, %v720_v27  ;;  %v1189_v32 = vadd.f32 %v2571_v17, %v848_v28  ;;  %v722_v33 = vpop.f32.mrb[15].mxu0  ;;  %v850_v34 = vpop.f32.mrb[15].mxu1 }
 0x130   :  { %vm1220_vm12 = vcmp.ge.f32.partialorder %v1156_v23, 0.0  ;;  %vm1252_vm13 = vcmp.ge.f32.partialorder %v1188_v24, 0.0 }
 0x131   :  { %vm1221_vm14 = vcmp.ge.f32.partialorder %v1157_v31, 0.0  ;;  %v1285_v35 = vmul.f32 0.2, %v1157_v31  ;;  %vm1253_vm15 = vcmp.ge.f32.partialorder %v1189_v32, 0.0  ;;  %v1317_v36 = vmul.f32 0.2, %v1189_v32 }
 0x132   :  { %v1348_v37 = vsel %vm1220_vm12, %v1156_v23, %v1284_v29  ;;  %v1380_v38 = vsel %vm1252_vm13, %v1188_v24, %v1316_v30 }
 0x133   :  { %v1349_v39 = vsel %vm1221_vm14, %v1157_v31, %v1285_v35  ;;  %v1381_v40 = vsel %vm1253_vm15, %v1189_v32, %v1317_v36 }
 0x134   :  { %v725_v41 = vpop.f32.mrb[16].mxu0  ;;  %v853_v42 = vpop.f32.mrb[16].mxu1  ;;  %v1957_v43 = vpack.c.bf16 %v1349_v39, %v1348_v37  ;;  %v2037_v44 = vpack.c.bf16 %v1381_v40, %v1380_v38 }
 0x135   :  { %v1158_v45 = vadd.f32 %v2571_v17, %v725_v41  ;;  %v1190_v46 = vadd.f32 %v2571_v17, %v853_v42  ;;  %v727_v47 = vpop.f32.mrb[17].mxu0  ;;  %v855_v48 = vpop.f32.mrb[17].mxu1 }
 0x136   :  { %v728_v49 = vpop.f32.mrb[18].mxu0  ;;  %v856_v50 = vpop.f32.mrb[18].mxu1  ;;  %2101 = vst [vmem:[%s2736_s3 + $0x18] sm:$0xff] %v1957_v43   ;;  %2117 = vst [vmem:[%s2736_s3 + $0x98] sm:$0xff] %v2037_v44  }
 0x137   :  { %v1286_v51 = vmul.f32 0.2, %v1158_v45  ;;  %v1318_v52 = vmul.f32 0.2, %v1190_v46  ;;  %v1159_v53 = vadd.f32 %v2571_v17, %v728_v49  ;;  %v1191_v54 = vadd.f32 %v2571_v17, %v856_v50  ;;  %v730_v55 = vpop.f32.mrb[19].mxu0  ;;  %v858_v56 = vpop.f32.mrb[19].mxu1 }
 0x138   :  { %vm1222_vm0 = vcmp.ge.f32.partialorder %v1158_v45, 0.0  ;;  %vm1254_vm1 = vcmp.ge.f32.partialorder %v1190_v46, 0.0 }
 0x139   :  { %vm1223_vm2 = vcmp.ge.f32.partialorder %v1159_v53, 0.0  ;;  %v1287_v57 = vmul.f32 0.2, %v1159_v53  ;;  %vm1255_vm3 = vcmp.ge.f32.partialorder %v1191_v54, 0.0  ;;  %v1319_v58 = vmul.f32 0.2, %v1191_v54 }
 0x13a   :  { %v1350_v59 = vsel %vm1222_vm0, %v1158_v45, %v1286_v51  ;;  %v1382_v60 = vsel %vm1254_vm1, %v1190_v46, %v1318_v52 }
 0x13b   :  { %v1351_v61 = vsel %vm1223_vm2, %v1159_v53, %v1287_v57  ;;  %v1383_v62 = vsel %vm1255_vm3, %v1191_v54, %v1319_v58 }
 0x13c   :  { %v733_v63 = vpop.f32.mrb[20].mxu0  ;;  %v861_v0 = vpop.f32.mrb[20].mxu1  ;;  %v1962_v1 = vpack.c.bf16 %v1351_v61, %v1350_v59  ;;  %v2042_v2 = vpack.c.bf16 %v1383_v62, %v1382_v60 }
 0x13d   :  { %v1160_v3 = vadd.f32 %v2571_v17, %v733_v63  ;;  %v1192_v4 = vadd.f32 %v2571_v17, %v861_v0  ;;  %v735_v5 = vpop.f32.mrb[21].mxu0  ;;  %v863_v6 = vpop.f32.mrb[21].mxu1 }
 0x13e   :  { %v736_v7 = vpop.f32.mrb[22].mxu0  ;;  %v864_v8 = vpop.f32.mrb[22].mxu1  ;;  %2102 = vst [vmem:[%s2736_s3 + $0x20] sm:$0xff] %v1962_v1   ;;  %2118 = vst [vmem:[%s2736_s3 + $0xa0] sm:$0xff] %v2042_v2  }
 0x13f   :  { %v1288_v9 = vmul.f32 0.2, %v1160_v3  ;;  %v1320_v10 = vmul.f32 0.2, %v1192_v4  ;;  %v1161_v11 = vadd.f32 %v2571_v17, %v736_v7  ;;  %v1193_v12 = vadd.f32 %v2571_v17, %v864_v8  ;;  %v738_v13 = vpop.f32.mrb[23].mxu0  ;;  %v866_v14 = vpop.f32.mrb[23].mxu1 }
 0x140   :  { %vm1224_vm4 = vcmp.ge.f32.partialorder %v1160_v3, 0.0  ;;  %vm1256_vm5 = vcmp.ge.f32.partialorder %v1192_v4, 0.0 }
 0x141   :  { %vm1225_vm6 = vcmp.ge.f32.partialorder %v1161_v11, 0.0  ;;  %v1289_v15 = vmul.f32 0.2, %v1161_v11  ;;  %vm1257_vm7 = vcmp.ge.f32.partialorder %v1193_v12, 0.0  ;;  %v1321_v16 = vmul.f32 0.2, %v1193_v12 }
 0x142   :  { %v1352_v18 = vsel %vm1224_vm4, %v1160_v3, %v1288_v9  ;;  %v1384_v19 = vsel %vm1256_vm5, %v1192_v4, %v1320_v10 }
 0x143   :  { %v1353_v20 = vsel %vm1225_vm6, %v1161_v11, %v1289_v15  ;;  %v1385_v21 = vsel %vm1257_vm7, %v1193_v12, %v1321_v16 }
 0x144   :  { %v741_v22 = vpop.f32.mrb[24].mxu0  ;;  %v869_v23 = vpop.f32.mrb[24].mxu1  ;;  %v1967_v24 = vpack.c.bf16 %v1353_v20, %v1352_v18  ;;  %v2047_v25 = vpack.c.bf16 %v1385_v21, %v1384_v19 }
 0x145   :  { %v1162_v26 = vadd.f32 %v2571_v17, %v741_v22  ;;  %v1194_v27 = vadd.f32 %v2571_v17, %v869_v23  ;;  %v743_v28 = vpop.f32.mrb[25].mxu0  ;;  %v871_v29 = vpop.f32.mrb[25].mxu1 }
 0x146   :  { %v744_v30 = vpop.f32.mrb[26].mxu0  ;;  %v872_v31 = vpop.f32.mrb[26].mxu1  ;;  %2103 = vst [vmem:[%s2736_s3 + $0x28] sm:$0xff] %v1967_v24   ;;  %2119 = vst [vmem:[%s2736_s3 + $0xa8] sm:$0xff] %v2047_v25  }
 0x147   :  { %v1290_v32 = vmul.f32 0.2, %v1162_v26  ;;  %v1322_v33 = vmul.f32 0.2, %v1194_v27  ;;  %v1163_v34 = vadd.f32 %v2571_v17, %v744_v30  ;;  %v1195_v35 = vadd.f32 %v2571_v17, %v872_v31  ;;  %v746_v36 = vpop.f32.mrb[27].mxu0  ;;  %v874_v37 = vpop.f32.mrb[27].mxu1 }
 0x148   :  { %vm1226_vm8 = vcmp.ge.f32.partialorder %v1162_v26, 0.0  ;;  %vm1258_vm9 = vcmp.ge.f32.partialorder %v1194_v27, 0.0 }
 0x149   :  { %vm1227_vm10 = vcmp.ge.f32.partialorder %v1163_v34, 0.0  ;;  %v1291_v38 = vmul.f32 0.2, %v1163_v34  ;;  %vm1259_vm11 = vcmp.ge.f32.partialorder %v1195_v35, 0.0  ;;  %v1323_v39 = vmul.f32 0.2, %v1195_v35 }
 0x14a   :  { %v1354_v40 = vsel %vm1226_vm8, %v1162_v26, %v1290_v32  ;;  %v1386_v41 = vsel %vm1258_vm9, %v1194_v27, %v1322_v33 }
 0x14b   :  { %v1355_v42 = vsel %vm1227_vm10, %v1163_v34, %v1291_v38  ;;  %v1387_v43 = vsel %vm1259_vm11, %v1195_v35, %v1323_v39 }
 0x14c   :  { %v749_v44 = vpop.f32.mrb[28].mxu0  ;;  %v877_v45 = vpop.f32.mrb[28].mxu1  ;;  %v1972_v46 = vpack.c.bf16 %v1355_v42, %v1354_v40  ;;  %v2052_v47 = vpack.c.bf16 %v1387_v43, %v1386_v41 }
 0x14d   :  { %v1164_v48 = vadd.f32 %v2571_v17, %v749_v44  ;;  %v1196_v49 = vadd.f32 %v2571_v17, %v877_v45  ;;  %v751_v50 = vpop.f32.mrb[29].mxu0  ;;  %v879_v51 = vpop.f32.mrb[29].mxu1 }
 0x14e   :  { %v752_v52 = vpop.f32.mrb[30].mxu0  ;;  %v880_v53 = vpop.f32.mrb[30].mxu1  ;;  %2104 = vst [vmem:[%s2736_s3 + $0x30] sm:$0xff] %v1972_v46   ;;  %2120 = vst [vmem:[%s2736_s3 + $0xb0] sm:$0xff] %v2052_v47  }
 0x14f   :  { %v1292_v54 = vmul.f32 0.2, %v1164_v48  ;;  %v1324_v55 = vmul.f32 0.2, %v1196_v49  ;;  %v1165_v56 = vadd.f32 %v2571_v17, %v752_v52  ;;  %v1197_v57 = vadd.f32 %v2571_v17, %v880_v53  ;;  %v754_v58 = vpop.f32.mrb[31].mxu0  ;;  %v882_v59 = vpop.f32.mrb[31].mxu1 }
 0x150   :  { %vm1228_vm12 = vcmp.ge.f32.partialorder %v1164_v48, 0.0  ;;  %vm1260_vm13 = vcmp.ge.f32.partialorder %v1196_v49, 0.0 }
 0x151   :  { %vm1229_vm14 = vcmp.ge.f32.partialorder %v1165_v56, 0.0  ;;  %v1293_v60 = vmul.f32 0.2, %v1165_v56  ;;  %vm1261_vm15 = vcmp.ge.f32.partialorder %v1197_v57, 0.0  ;;  %v1325_v61 = vmul.f32 0.2, %v1197_v57 }
 0x152   :  { %v1356_v62 = vsel %vm1228_vm12, %v1164_v48, %v1292_v54  ;;  %v1388_v63 = vsel %vm1260_vm13, %v1196_v49, %v1324_v55 }
 0x153   :  { %v1357_v0 = vsel %vm1229_vm14, %v1165_v56, %v1293_v60  ;;  %v1389_v1 = vsel %vm1261_vm15, %v1197_v57, %v1325_v61 }
 0x154   :  { %v757_v2 = vpop.f32.mrb[32].mxu0  ;;  %v885_v3 = vpop.f32.mrb[32].mxu1  ;;  %v1977_v4 = vpack.c.bf16 %v1357_v0, %v1356_v62  ;;  %v2057_v5 = vpack.c.bf16 %v1389_v1, %v1388_v63 }
 0x155   :  { %v1166_v6 = vadd.f32 %v2571_v17, %v757_v2  ;;  %v1198_v7 = vadd.f32 %v2571_v17, %v885_v3  ;;  %v759_v8 = vpop.f32.mrb[33].mxu0  ;;  %v887_v9 = vpop.f32.mrb[33].mxu1 }
 0x156   :  { %v760_v10 = vpop.f32.mrb[34].mxu0  ;;  %v888_v11 = vpop.f32.mrb[34].mxu1  ;;  %2105 = vst [vmem:[%s2736_s3 + $0x38] sm:$0xff] %v1977_v4   ;;  %2121 = vst [vmem:[%s2736_s3 + $0xb8] sm:$0xff] %v2057_v5  }
 0x157   :  { %v1294_v12 = vmul.f32 0.2, %v1166_v6  ;;  %v1326_v13 = vmul.f32 0.2, %v1198_v7  ;;  %v1167_v14 = vadd.f32 %v2571_v17, %v760_v10  ;;  %v1199_v15 = vadd.f32 %v2571_v17, %v888_v11  ;;  %v762_v16 = vpop.f32.mrb[35].mxu0  ;;  %v890_v18 = vpop.f32.mrb[35].mxu1 }
 0x158   :  { %vm1230_vm0 = vcmp.ge.f32.partialorder %v1166_v6, 0.0  ;;  %vm1262_vm1 = vcmp.ge.f32.partialorder %v1198_v7, 0.0 }
 0x159   :  { %vm1231_vm2 = vcmp.ge.f32.partialorder %v1167_v14, 0.0  ;;  %v1295_v19 = vmul.f32 0.2, %v1167_v14  ;;  %vm1263_vm3 = vcmp.ge.f32.partialorder %v1199_v15, 0.0  ;;  %v1327_v20 = vmul.f32 0.2, %v1199_v15 }
 0x15a   :  { %v1358_v21 = vsel %vm1230_vm0, %v1166_v6, %v1294_v12  ;;  %v1390_v22 = vsel %vm1262_vm1, %v1198_v7, %v1326_v13 }
 0x15b   :  { %v1359_v23 = vsel %vm1231_vm2, %v1167_v14, %v1295_v19  ;;  %v1391_v24 = vsel %vm1263_vm3, %v1199_v15, %v1327_v20 }
 0x15c   :  { %v765_v25 = vpop.f32.mrb[36].mxu0  ;;  %v893_v26 = vpop.f32.mrb[36].mxu1  ;;  %v1982_v27 = vpack.c.bf16 %v1359_v23, %v1358_v21  ;;  %v2062_v28 = vpack.c.bf16 %v1391_v24, %v1390_v22 }
 0x15d   :  { %v1168_v29 = vadd.f32 %v2571_v17, %v765_v25  ;;  %v1200_v30 = vadd.f32 %v2571_v17, %v893_v26  ;;  %v767_v31 = vpop.f32.mrb[37].mxu0  ;;  %v895_v32 = vpop.f32.mrb[37].mxu1 }
 0x15e   :  { %v768_v33 = vpop.f32.mrb[38].mxu0  ;;  %v896_v34 = vpop.f32.mrb[38].mxu1  ;;  %2106 = vst [vmem:[%s2736_s3 + $0x40] sm:$0xff] %v1982_v27   ;;  %2122 = vst [vmem:[%s2736_s3 + $0xc0] sm:$0xff] %v2062_v28  }
 0x15f   :  { %v1296_v35 = vmul.f32 0.2, %v1168_v29  ;;  %v1328_v36 = vmul.f32 0.2, %v1200_v30  ;;  %v1169_v37 = vadd.f32 %v2571_v17, %v768_v33  ;;  %v1201_v38 = vadd.f32 %v2571_v17, %v896_v34  ;;  %v770_v39 = vpop.f32.mrb[39].mxu0  ;;  %v898_v40 = vpop.f32.mrb[39].mxu1 }
 0x160   :  { %vm1232_vm4 = vcmp.ge.f32.partialorder %v1168_v29, 0.0  ;;  %vm1264_vm5 = vcmp.ge.f32.partialorder %v1200_v30, 0.0 }
 0x161   :  { %vm1233_vm6 = vcmp.ge.f32.partialorder %v1169_v37, 0.0  ;;  %v1297_v41 = vmul.f32 0.2, %v1169_v37  ;;  %vm1265_vm7 = vcmp.ge.f32.partialorder %v1201_v38, 0.0  ;;  %v1329_v42 = vmul.f32 0.2, %v1201_v38 }
 0x162   :  { %v1360_v43 = vsel %vm1232_vm4, %v1168_v29, %v1296_v35  ;;  %v1392_v44 = vsel %vm1264_vm5, %v1200_v30, %v1328_v36 }
 0x163   :  { %v1361_v45 = vsel %vm1233_vm6, %v1169_v37, %v1297_v41  ;;  %v1393_v46 = vsel %vm1265_vm7, %v1201_v38, %v1329_v42 }
 0x164   :  { %v773_v47 = vpop.f32.mrb[40].mxu0  ;;  %v901_v48 = vpop.f32.mrb[40].mxu1  ;;  %v1987_v49 = vpack.c.bf16 %v1361_v45, %v1360_v43  ;;  %v2067_v50 = vpack.c.bf16 %v1393_v46, %v1392_v44 }
 0x165   :  { %v1170_v51 = vadd.f32 %v2571_v17, %v773_v47  ;;  %v1202_v52 = vadd.f32 %v2571_v17, %v901_v48  ;;  %v775_v53 = vpop.f32.mrb[41].mxu0  ;;  %v903_v54 = vpop.f32.mrb[41].mxu1 }
 0x166   :  { %v776_v55 = vpop.f32.mrb[42].mxu0  ;;  %v904_v56 = vpop.f32.mrb[42].mxu1  ;;  %2107 = vst [vmem:[%s2736_s3 + $0x48] sm:$0xff] %v1987_v49   ;;  %2123 = vst [vmem:[%s2736_s3 + $0xc8] sm:$0xff] %v2067_v50  }
 0x167   :  { %v1298_v57 = vmul.f32 0.2, %v1170_v51  ;;  %v1330_v58 = vmul.f32 0.2, %v1202_v52  ;;  %v1171_v59 = vadd.f32 %v2571_v17, %v776_v55  ;;  %v1203_v60 = vadd.f32 %v2571_v17, %v904_v56  ;;  %v778_v61 = vpop.f32.mrb[43].mxu0  ;;  %v906_v62 = vpop.f32.mrb[43].mxu1 }
 0x168   :  { %vm1234_vm8 = vcmp.ge.f32.partialorder %v1170_v51, 0.0  ;;  %vm1266_vm9 = vcmp.ge.f32.partialorder %v1202_v52, 0.0 }
 0x169   :  { %vm1235_vm10 = vcmp.ge.f32.partialorder %v1171_v59, 0.0  ;;  %v1299_v63 = vmul.f32 0.2, %v1171_v59  ;;  %vm1267_vm11 = vcmp.ge.f32.partialorder %v1203_v60, 0.0  ;;  %v1331_v0 = vmul.f32 0.2, %v1203_v60 }
 0x16a   :  { %v1362_v1 = vsel %vm1234_vm8, %v1170_v51, %v1298_v57  ;;  %v1394_v2 = vsel %vm1266_vm9, %v1202_v52, %v1330_v58 }
 0x16b   :  { %v1363_v3 = vsel %vm1235_vm10, %v1171_v59, %v1299_v63  ;;  %v1395_v4 = vsel %vm1267_vm11, %v1203_v60, %v1331_v0 }
 0x16c   :  { %v781_v5 = vpop.f32.mrb[44].mxu0  ;;  %v909_v6 = vpop.f32.mrb[44].mxu1  ;;  %v1992_v7 = vpack.c.bf16 %v1363_v3, %v1362_v1  ;;  %v2072_v8 = vpack.c.bf16 %v1395_v4, %v1394_v2 }
 0x16d   :  { %v1172_v9 = vadd.f32 %v2571_v17, %v781_v5  ;;  %v1204_v10 = vadd.f32 %v2571_v17, %v909_v6  ;;  %v783_v11 = vpop.f32.mrb[45].mxu0  ;;  %v911_v12 = vpop.f32.mrb[45].mxu1 }
 0x16e   :  { %v784_v13 = vpop.f32.mrb[46].mxu0  ;;  %v912_v14 = vpop.f32.mrb[46].mxu1  ;;  %2108 = vst [vmem:[%s2736_s3 + $0x50] sm:$0xff] %v1992_v7   ;;  %2124 = vst [vmem:[%s2736_s3 + $0xd0] sm:$0xff] %v2072_v8  }
 0x16f   :  { %v1300_v15 = vmul.f32 0.2, %v1172_v9  ;;  %v1332_v16 = vmul.f32 0.2, %v1204_v10  ;;  %v1173_v18 = vadd.f32 %v2571_v17, %v784_v13  ;;  %v1205_v19 = vadd.f32 %v2571_v17, %v912_v14  ;;  %v786_v20 = vpop.f32.mrb[47].mxu0  ;;  %v914_v21 = vpop.f32.mrb[47].mxu1 }
 0x170   :  { %vm1236_vm12 = vcmp.ge.f32.partialorder %v1172_v9, 0.0  ;;  %vm1268_vm13 = vcmp.ge.f32.partialorder %v1204_v10, 0.0 }
 0x171   :  { %vm1237_vm14 = vcmp.ge.f32.partialorder %v1173_v18, 0.0  ;;  %v1301_v22 = vmul.f32 0.2, %v1173_v18  ;;  %vm1269_vm15 = vcmp.ge.f32.partialorder %v1205_v19, 0.0  ;;  %v1333_v23 = vmul.f32 0.2, %v1205_v19 }
 0x172   :  { %v1364_v24 = vsel %vm1236_vm12, %v1172_v9, %v1300_v15  ;;  %v1396_v25 = vsel %vm1268_vm13, %v1204_v10, %v1332_v16 }
 0x173   :  { %v1365_v26 = vsel %vm1237_vm14, %v1173_v18, %v1301_v22  ;;  %v1397_v27 = vsel %vm1269_vm15, %v1205_v19, %v1333_v23 }
 0x174   :  { %v789_v28 = vpop.f32.mrb[48].mxu0  ;;  %v917_v29 = vpop.f32.mrb[48].mxu1  ;;  %v1997_v30 = vpack.c.bf16 %v1365_v26, %v1364_v24  ;;  %v2077_v31 = vpack.c.bf16 %v1397_v27, %v1396_v25 }
 0x175   :  { %v1174_v32 = vadd.f32 %v2571_v17, %v789_v28  ;;  %v1206_v33 = vadd.f32 %v2571_v17, %v917_v29  ;;  %v791_v34 = vpop.f32.mrb[49].mxu0  ;;  %v919_v35 = vpop.f32.mrb[49].mxu1 }
 0x176   :  { %v792_v36 = vpop.f32.mrb[50].mxu0  ;;  %v920_v37 = vpop.f32.mrb[50].mxu1  ;;  %2109 = vst [vmem:[%s2736_s3 + $0x58] sm:$0xff] %v1997_v30   ;;  %2125 = vst [vmem:[%s2736_s3 + $0xd8] sm:$0xff] %v2077_v31  }
 0x177   :  { %v1302_v38 = vmul.f32 0.2, %v1174_v32  ;;  %v1334_v39 = vmul.f32 0.2, %v1206_v33  ;;  %v1175_v40 = vadd.f32 %v2571_v17, %v792_v36  ;;  %v1207_v41 = vadd.f32 %v2571_v17, %v920_v37  ;;  %v794_v42 = vpop.f32.mrb[51].mxu0  ;;  %v922_v43 = vpop.f32.mrb[51].mxu1 }
 0x178   :  { %vm1238_vm0 = vcmp.ge.f32.partialorder %v1174_v32, 0.0  ;;  %vm1270_vm1 = vcmp.ge.f32.partialorder %v1206_v33, 0.0 }
 0x179   :  { %vm1239_vm2 = vcmp.ge.f32.partialorder %v1175_v40, 0.0  ;;  %v1303_v44 = vmul.f32 0.2, %v1175_v40  ;;  %vm1271_vm3 = vcmp.ge.f32.partialorder %v1207_v41, 0.0  ;;  %v1335_v45 = vmul.f32 0.2, %v1207_v41 }
 0x17a   :  { %v1366_v46 = vsel %vm1238_vm0, %v1174_v32, %v1302_v38  ;;  %v1398_v47 = vsel %vm1270_vm1, %v1206_v33, %v1334_v39 }
 0x17b   :  { %v1367_v48 = vsel %vm1239_vm2, %v1175_v40, %v1303_v44  ;;  %v1399_v49 = vsel %vm1271_vm3, %v1207_v41, %v1335_v45 }
 0x17c   :  { %v797_v50 = vpop.f32.mrb[52].mxu0  ;;  %v925_v51 = vpop.f32.mrb[52].mxu1  ;;  %v2002_v52 = vpack.c.bf16 %v1367_v48, %v1366_v46  ;;  %v2082_v53 = vpack.c.bf16 %v1399_v49, %v1398_v47 }
 0x17d   :  { %v1176_v54 = vadd.f32 %v2571_v17, %v797_v50  ;;  %v1208_v55 = vadd.f32 %v2571_v17, %v925_v51  ;;  %v799_v56 = vpop.f32.mrb[53].mxu0  ;;  %v927_v57 = vpop.f32.mrb[53].mxu1 }
 0x17e   :  { %v800_v58 = vpop.f32.mrb[54].mxu0  ;;  %v928_v59 = vpop.f32.mrb[54].mxu1  ;;  %2110 = vst [vmem:[%s2736_s3 + $0x60] sm:$0xff] %v2002_v52   ;;  %2126 = vst [vmem:[%s2736_s3 + $0xe0] sm:$0xff] %v2082_v53  }
 0x17f   :  { %v1304_v60 = vmul.f32 0.2, %v1176_v54  ;;  %v1336_v61 = vmul.f32 0.2, %v1208_v55  ;;  %v1177_v62 = vadd.f32 %v2571_v17, %v800_v58  ;;  %v1209_v63 = vadd.f32 %v2571_v17, %v928_v59  ;;  %v802_v0 = vpop.f32.mrb[55].mxu0  ;;  %v930_v1 = vpop.f32.mrb[55].mxu1 }
 0x180   :  { %vm1240_vm4 = vcmp.ge.f32.partialorder %v1176_v54, 0.0  ;;  %vm1272_vm5 = vcmp.ge.f32.partialorder %v1208_v55, 0.0 }
 0x181   :  { %vm1241_vm6 = vcmp.ge.f32.partialorder %v1177_v62, 0.0  ;;  %v1305_v2 = vmul.f32 0.2, %v1177_v62  ;;  %vm1273_vm7 = vcmp.ge.f32.partialorder %v1209_v63, 0.0  ;;  %v1337_v3 = vmul.f32 0.2, %v1209_v63 }
 0x182   :  { %v1368_v4 = vsel %vm1240_vm4, %v1176_v54, %v1304_v60  ;;  %v1400_v5 = vsel %vm1272_vm5, %v1208_v55, %v1336_v61 }
 0x183   :  { %v1369_v6 = vsel %vm1241_vm6, %v1177_v62, %v1305_v2  ;;  %v1401_v7 = vsel %vm1273_vm7, %v1209_v63, %v1337_v3 }
 0x184   :  { %v805_v8 = vpop.f32.mrb[56].mxu0  ;;  %v933_v9 = vpop.f32.mrb[56].mxu1  ;;  %v2007_v10 = vpack.c.bf16 %v1369_v6, %v1368_v4  ;;  %v2087_v11 = vpack.c.bf16 %v1401_v7, %v1400_v5 }
 0x185   :  { %v1178_v12 = vadd.f32 %v2571_v17, %v805_v8  ;;  %v1210_v13 = vadd.f32 %v2571_v17, %v933_v9  ;;  %v807_v14 = vpop.f32.mrb[57].mxu0  ;;  %v935_v15 = vpop.f32.mrb[57].mxu1 }
 0x186   :  { %v808_v16 = vpop.f32.mrb[58].mxu0  ;;  %v936_v18 = vpop.f32.mrb[58].mxu1  ;;  %2111 = vst [vmem:[%s2736_s3 + $0x68] sm:$0xff] %v2007_v10   ;;  %2127 = vst [vmem:[%s2736_s3 + $0xe8] sm:$0xff] %v2087_v11  }
 0x187   :  { %v1306_v19 = vmul.f32 0.2, %v1178_v12  ;;  %v1338_v20 = vmul.f32 0.2, %v1210_v13  ;;  %v1179_v21 = vadd.f32 %v2571_v17, %v808_v16  ;;  %v1211_v22 = vadd.f32 %v2571_v17, %v936_v18  ;;  %v810_v23 = vpop.f32.mrb[59].mxu0  ;;  %v938_v24 = vpop.f32.mrb[59].mxu1 }
 0x188   :  { %vm1242_vm8 = vcmp.ge.f32.partialorder %v1178_v12, 0.0  ;;  %vm1274_vm9 = vcmp.ge.f32.partialorder %v1210_v13, 0.0 }
 0x189   :  { %vm1243_vm10 = vcmp.ge.f32.partialorder %v1179_v21, 0.0  ;;  %v1307_v25 = vmul.f32 0.2, %v1179_v21  ;;  %vm1275_vm11 = vcmp.ge.f32.partialorder %v1211_v22, 0.0  ;;  %v1339_v26 = vmul.f32 0.2, %v1211_v22 }
 0x18a   :  { %v1370_v27 = vsel %vm1242_vm8, %v1178_v12, %v1306_v19  ;;  %v1402_v28 = vsel %vm1274_vm9, %v1210_v13, %v1338_v20 }
 0x18b   :  { %v1371_v29 = vsel %vm1243_vm10, %v1179_v21, %v1307_v25  ;;  %v1403_v30 = vsel %vm1275_vm11, %v1211_v22, %v1339_v26 }
 0x18c   :  { %v813_v31 = vpop.f32.mrb[60].mxu0  ;;  %v941_v32 = vpop.f32.mrb[60].mxu1  ;;  %v2012_v33 = vpack.c.bf16 %v1371_v29, %v1370_v27  ;;  %v2092_v34 = vpack.c.bf16 %v1403_v30, %v1402_v28 }
 0x18d   :  { %v1180_v35 = vadd.f32 %v2571_v17, %v813_v31  ;;  %v1212_v36 = vadd.f32 %v2571_v17, %v941_v32  ;;  %v815_v37 = vpop.f32.mrb[61].mxu0  ;;  %v943_v38 = vpop.f32.mrb[61].mxu1 }
 0x18e   :  { %v816_v39 = vpop.f32.mrb[62].mxu0  ;;  %v944_v40 = vpop.f32.mrb[62].mxu1  ;;  %2112 = vst [vmem:[%s2736_s3 + $0x70] sm:$0xff] %v2012_v33   ;;  %2128 = vst [vmem:[%s2736_s3 + $0xf0] sm:$0xff] %v2092_v34  }
 0x18f   :  { %v1308_v41 = vmul.f32 0.2, %v1180_v35  ;;  %v1340_v42 = vmul.f32 0.2, %v1212_v36  ;;  %v1181_v43 = vadd.f32 %v2571_v17, %v816_v39  ;;  %v1213_v44 = vadd.f32 %v2571_v17, %v944_v40  ;;  %v818_v45 = vpop.f32.mrb[63].mxu0  ;;  %v946_v46 = vpop.f32.mrb[63].mxu1 }
 0x190   :  { %vm1244_vm12 = vcmp.ge.f32.partialorder %v1180_v35, 0.0  ;;  %vm1276_vm13 = vcmp.ge.f32.partialorder %v1212_v36, 0.0 }
 0x191   :  { %vm1245_vm14 = vcmp.ge.f32.partialorder %v1181_v43, 0.0  ;;  %v1309_v47 = vmul.f32 0.2, %v1181_v43  ;;  %vm1277_vm15 = vcmp.ge.f32.partialorder %v1213_v44, 0.0  ;;  %v1341_v48 = vmul.f32 0.2, %v1213_v44 }
 0x192   :  { %v1372_v49 = vsel %vm1244_vm12, %v1180_v35, %v1308_v41  ;;  %v1404_v50 = vsel %vm1276_vm13, %v1212_v36, %v1340_v42 }
 0x193   :  { %v1373_v51 = vsel %vm1245_vm14, %v1181_v43, %v1309_v47  ;;  %v1405_v52 = vsel %vm1277_vm15, %v1213_v44, %v1341_v48 }
 0x194   :  { %v2017_v53 = vpack.c.bf16 %v1373_v51, %v1372_v49  ;;  %v2097_v54 = vpack.c.bf16 %v1405_v52, %v1404_v50 }
 0x196   :  { %2113 = vst [vmem:[%s2736_s3 + $0x78] sm:$0xff] %v2017_v53   ;;  %2129 = vst [vmem:[%s2736_s3 + $0xf8] sm:$0xff] %v2097_v54  }

// kernel: patchgan_forward.6
= control target key start
LH: loop header
LB: loop body
LE: loop exit
PB: predicated region body
PF: predicated region fallthrough
CT: control target
= control target key end

     0   :  { %s975_s1 = inlined_call_operand.vmem [shape: bf16[256,128], index: 1, kind: input, shape index: {}]   ;;  %s976_s0 = inlined_call_operand.vmem [shape: bf16[128,256], index: 0, kind: input, shape index: {}]   ;;  %s977_s2 = inlined_call_operand.vmem [shape: bf16[128,128], index: 2, kind: output, shape index: {0}]   ;;  %s978_s3 = inlined_call_operand.vmem [shape: f32[1,1,128], index: 3, kind: output, shape index: {1}]   ;;  %s979_s4 = inlined_call_operand.vmem [shape: f32[1,1,128], index: 4, kind: output, shape index: {2}]  }
   0x1   :  { %v766_v0 = vld [vmem:[%s975_s1 + $0x40] sm:$0xff]   ;;  %v768_v2 = vld [vmem:[%s975_s1 + $0x48] sm:$0xff]   ;;  %v770_v4 = vld [vmem:[%s975_s1 + $0x50] sm:$0xff]  }
   0x2   :  { %v767_v1 = vld [vmem:[%s975_s1] sm:$0xff]   ;;  %686 = vmatprep.subr.bf16.mxu0 %v766_v0  ;;  %750 = vmatprep.subr.bf16.mxu1 %v766_v0  ;;  %v769_v3 = vld [vmem:[%s975_s1 + $0x8] sm:$0xff]   ;;  %v771_v5 = vld [vmem:[%s975_s1 + $0x10] sm:$0xff]  }
   0x3   :  { %687 = vmatpush3.bf16.msra.mxu0 %v767_v1  ;;  %758 = vmatpush3.bf16.msra.mxu1 %v767_v1  ;;  %v772_v6 = vld [vmem:[%s975_s1 + $0x58] sm:$0xff]   ;;  %v774_v8 = vld [vmem:[%s975_s1 + $0x60] sm:$0xff]   ;;  %v776_v10 = vld [vmem:[%s975_s1 + $0x68] sm:$0xff]  }
   0x4   :  { %688 = vmatprep.subr.bf16.mxu0 %v768_v2  ;;  %751 = vmatprep.subr.bf16.mxu1 %v768_v2  ;;  %v773_v7 = vld [vmem:[%s975_s1 + $0x18] sm:$0xff]   ;;  %v775_v9 = vld [vmem:[%s975_s1 + $0x20] sm:$0xff]   ;;  %v777_v12 = vld [vmem:[%s975_s1 + $0x28] sm:$0xff]  }
   0x5   :  { %v784_v11 = vld [vmem:[%s976_s0 + $0x4] ss:$8 sps:$4 sm:$0xff]   ;;  %v778_v14 = vld [vmem:[%s975_s1 + $0x70] sm:$0xff]   ;;  %v780_v16 = vld [vmem:[%s975_s1 + $0x78] sm:$0xff]  }
   0x6   :  { %v790_v13 = vld [vmem:[%s976_s0 + $0x44] ss:$8 sps:$4 sm:$0xff]   ;;  %307 = vmatprep.mubr.bf16.mxu0 %v784_v11  ;;  %v779_v15 = vld [vmem:[%s975_s1 + $0x30] sm:$0xff]   ;;  %v781_v17 = vld [vmem:[%s975_s1 + $0x38] sm:$0xff]  }
   0x7   :  { %689 = vmatpush3.bf16.msra.mxu0 %v769_v3  ;;  %759 = vmatpush3.bf16.msra.mxu1 %v769_v3  ;;  %v782_v18 = vld [vmem:[%s976_s0] ss:$8 sps:$4 sm:$0xff]   ;;  %v785_v20 = vld [vmem:[%s976_s0 + $0x14] ss:$8 sps:$4 sm:$0xff]   ;;  %v787_v22 = vld [vmem:[%s976_s0 + $0x10] ss:$8 sps:$4 sm:$0xff]  }
   0x8   :  { %690 = vmatprep.subr.bf16.mxu0 %v770_v4  ;;  %752 = vmatprep.subr.bf16.mxu1 %v770_v4  ;;  %v788_v19 = vld [vmem:[%s976_s0 + $0x40] ss:$8 sps:$4 sm:$0xff]   ;;  %v794_v21 = vld [vmem:[%s976_s0 + $0x54] ss:$8 sps:$4 sm:$0xff]   ;;  %v796_v23 = vld [vmem:[%s976_s0 + $0x50] ss:$8 sps:$4 sm:$0xff]  }
   0x9   :  { %339 = vmatprep.mubr.bf16.mxu1 %v790_v13  ;;  %v791_v24 = vld [vmem:[%s976_s0 + $0x24] ss:$8 sps:$4 sm:$0xff]   ;;  %v793_v26 = vld [vmem:[%s976_s0 + $0x20] ss:$8 sps:$4 sm:$0xff]   ;;  %v797_v28 = vld [vmem:[%s976_s0 + $0x34] ss:$8 sps:$4 sm:$0xff]  }
   0xa   :  { %v800_v25 = vld [vmem:[%s976_s0 + $0x64] ss:$8 sps:$4 sm:$0xff]   ;;  %v802_v27 = vld [vmem:[%s976_s0 + $0x60] ss:$8 sps:$4 sm:$0xff]   ;;  %v803_v29 = vld [vmem:[%s976_s0 + $0x74] ss:$8 sps:$4 sm:$0xff]  }
   0xb   :  { %691 = vmatpush3.bf16.msra.mxu0 %v771_v5  ;;  %760 = vmatpush3.bf16.msra.mxu1 %v771_v5  ;;  %v799_v30 = vld [vmem:[%s976_s0 + $0x30] ss:$8 sps:$4 sm:$0xff]  }
   0xc   :  { %692 = vmatprep.subr.bf16.mxu0 %v772_v6  ;;  %753 = vmatprep.subr.bf16.mxu1 %v772_v6  ;;  %v805_v31 = vld [vmem:[%s976_s0 + $0x70] ss:$8 sps:$4 sm:$0xff]  }
   0xf   :  { %693 = vmatpush3.bf16.msra.mxu0 %v773_v7  ;;  %761 = vmatpush3.bf16.msra.mxu1 %v773_v7 }
  0x10   :  { %694 = vmatprep.subr.bf16.mxu0 %v774_v8  ;;  %754 = vmatprep.subr.bf16.mxu1 %v774_v8 }
  0x13   :  { %695 = vmatpush3.bf16.msra.mxu0 %v775_v9  ;;  %762 = vmatpush3.bf16.msra.mxu1 %v775_v9 }
  0x14   :  { %696 = vmatprep.subr.bf16.mxu0 %v776_v10  ;;  %755 = vmatprep.subr.bf16.mxu1 %v776_v10 }
  0x17   :  { %697 = vmatpush3.bf16.msra.mxu0 %v777_v12  ;;  %763 = vmatpush3.bf16.msra.mxu1 %v777_v12 }
  0x18   :  { %698 = vmatprep.subr.bf16.mxu0 %v778_v14  ;;  %756 = vmatprep.subr.bf16.mxu1 %v778_v14 }
  0x1b   :  { %699 = vmatpush3.bf16.msra.mxu0 %v779_v15  ;;  %764 = vmatpush3.bf16.msra.mxu1 %v779_v15 }
  0x1c   :  { %700 = vmatprep.subr.bf16.mxu0 %v780_v16  ;;  %757 = vmatprep.subr.bf16.mxu1 %v780_v16 }
  0x1f   :  { %701 = vmatpush3.bf16.msra.mxu0 %v781_v17  ;;  %765 = vmatpush3.bf16.msra.mxu1 %v781_v17 }
  0x22   :  { %308 = vmatmul.mubr.bf16.vlgmr.msra.gmra.mrb[0].mxu0 %v782_v18  ;;  %340 = vmatmul.mubr.bf16.vlgmr.msra.gmra.mrb[0].mxu1 %v788_v19 }
  0x23   :  { %315 = vmatprep.mubr.bf16.mxu0 %v785_v20  ;;  %347 = vmatprep.mubr.bf16.mxu1 %v794_v21 }
  0x2a   :  { %316 = vmatmul.mubr.bf16.gmra.mrb[4].mxu0 %v787_v22  ;;  %348 = vmatmul.mubr.bf16.gmra.mrb[4].mxu1 %v796_v23 }
  0x2b   :  { %323 = vmatprep.mubr.bf16.mxu0 %v791_v24  ;;  %355 = vmatprep.mubr.bf16.mxu1 %v800_v25 }
  0x32   :  { %324 = vmatmul.mubr.bf16.gmra.mrb[8].mxu0 %v793_v26  ;;  %356 = vmatmul.mubr.bf16.gmra.mrb[8].mxu1 %v802_v27 }
  0x33   :  { %331 = vmatprep.mubr.bf16.mxu0 %v797_v28  ;;  %363 = vmatprep.mubr.bf16.mxu1 %v803_v29 }
  0x3a   :  { %332 = vmatmul.mubr.bf16.gmra.mrb[12].mxu0 %v799_v30  ;;  %364 = vmatmul.mubr.bf16.gmra.mrb[12].mxu1 %v805_v31 }
  0xf5   :  { %v702_v32 = vpop.f32.mrb[0].mxu0  ;;  %v726_v33 = vpop.f32.mrb[0].mxu1 }
  0xf6   :  { %v703_v34 = vpop.f32.mrb[1].mxu0  ;;  %v727_v35 = vpop.f32.mrb[1].mxu1 }
  0xf7   :  { %v704_v36 = vadd.f32 %v703_v34, %v702_v32  ;;  %v705_v37 = vpop.f32.mrb[2].mxu0  ;;  %v927_v38 = vadd.f32 %v727_v35, %v726_v33  ;;  %v729_v39 = vpop.f32.mrb[2].mxu1 }
  0xf8   :  { %v706_v40 = vpop.f32.mrb[3].mxu0  ;;  %v730_v41 = vpop.f32.mrb[3].mxu1 }
  0xf9   :  { %v707_v42 = vadd.f32 %v706_v40, %v705_v37  ;;  %v929_v43 = vadd.f32 %v730_v41, %v729_v39  ;;  %v445_v44 = vmul.f32 %v704_v36, %v704_v36 }
  0xfb   :  { %v423_v45 = vadd.f32 %v707_v42, %v704_v36  ;;  %v446_v46 = vmul.f32 %v707_v42, %v707_v42  ;;  %v642_v47 = vpack.c.bf16 %v707_v42, %v704_v36  ;;  %v662_v48 = vpack.c.bf16 %v929_v43, %v927_v38 }
  0xfd   :  { %v461_v49 = vadd.f32 %v446_v46, %v445_v44  ;;  %643 = vst [vmem:[%s977_s2] sm:$0xff] %v642_v47   ;;  %v708_v50 = vpop.f32.mrb[4].mxu0  ;;  %v732_v51 = vpop.f32.mrb[4].mxu1  ;;  %682 = vst [vmem:[%s977_s2 + $0x20] sm:$0xff] %v662_v48   ;;  %v453_v47 = vmul.f32 %v927_v38, %v927_v38 }
  0xfe   :  { %v709_v52 = vpop.f32.mrb[5].mxu0  ;;  %v733_v53 = vpop.f32.mrb[5].mxu1 }
  0xff   :  { %v710_v54 = vadd.f32 %v709_v52, %v708_v50  ;;  %v711_v55 = vpop.f32.mrb[6].mxu0  ;;  %v939_v56 = vadd.f32 %v733_v53, %v732_v51  ;;  %v735_v57 = vpop.f32.mrb[6].mxu1  ;;  %v454_v50 = vmul.f32 %v929_v43, %v929_v43 }
 0x100   :  { %v712_v58 = vpop.f32.mrb[7].mxu0  ;;  %v736_v59 = vpop.f32.mrb[7].mxu1 }
 0x101   :  { %v424_v60 = vadd.f32 %v710_v54, %v423_v45  ;;  %v447_v61 = vmul.f32 %v710_v54, %v710_v54  ;;  %v713_v62 = vadd.f32 %v712_v58, %v711_v55  ;;  %v737_v63 = vadd.f32 %v736_v59, %v735_v57 }
 0x102   :  { %v455_v53 = vmul.f32 %v939_v56, %v939_v56 }
 0x103   :  { %v462_v0 = vadd.f32 %v461_v49, %v447_v61  ;;  %v425_v1 = vadd.f32 %v713_v62, %v424_v60  ;;  %v448_v2 = vmul.f32 %v713_v62, %v713_v62  ;;  %v647_v3 = vpack.c.bf16 %v713_v62, %v710_v54 }
 0x104   :  { %v667_v4 = vpack.c.bf16 %v737_v63, %v939_v56  ;;  %v456_v55 = vmul.f32 %v737_v63, %v737_v63 }
 0x105   :  { %v463_v5 = vadd.f32 %v462_v0, %v448_v2  ;;  %679 = vst [vmem:[%s977_s2 + $0x8] sm:$0xff] %v647_v3   ;;  %v714_v6 = vpop.f32.mrb[8].mxu0  ;;  %v738_v7 = vpop.f32.mrb[8].mxu1 }
 0x106   :  { %v715_v8 = vpop.f32.mrb[9].mxu0  ;;  %683 = vst [vmem:[%s977_s2 + $0x28] sm:$0xff] %v667_v4   ;;  %v739_v9 = vpop.f32.mrb[9].mxu1 }
 0x107   :  { %v716_v10 = vadd.f32 %v715_v8, %v714_v6  ;;  %v717_v11 = vpop.f32.mrb[10].mxu0  ;;  %v740_v12 = vadd.f32 %v739_v9, %v738_v7  ;;  %v741_v13 = vpop.f32.mrb[10].mxu1 }
 0x108   :  { %v718_v14 = vpop.f32.mrb[11].mxu0  ;;  %v742_v15 = vpop.f32.mrb[11].mxu1 }
 0x109   :  { %v426_v16 = vadd.f32 %v716_v10, %v425_v1  ;;  %v449_v17 = vmul.f32 %v716_v10, %v716_v10  ;;  %v719_v18 = vadd.f32 %v718_v14, %v717_v11  ;;  %v743_v19 = vadd.f32 %v742_v15, %v741_v13 }
 0x10a   :  { %v457_v60 = vmul.f32 %v740_v12, %v740_v12 }
 0x10b   :  { %v464_v20 = vadd.f32 %v463_v5, %v449_v17  ;;  %v427_v21 = vadd.f32 %v719_v18, %v426_v16  ;;  %v450_v22 = vmul.f32 %v719_v18, %v719_v18  ;;  %v652_v23 = vpack.c.bf16 %v719_v18, %v716_v10 }
 0x10c   :  { %v672_v24 = vpack.c.bf16 %v743_v19, %v740_v12  ;;  %v458_v1 = vmul.f32 %v743_v19, %v743_v19 }
 0x10d   :  { %v465_v25 = vadd.f32 %v464_v20, %v450_v22  ;;  %680 = vst [vmem:[%s977_s2 + $0x10] sm:$0xff] %v652_v23   ;;  %v720_v26 = vpop.f32.mrb[12].mxu0  ;;  %v744_v27 = vpop.f32.mrb[12].mxu1 }
 0x10e   :  { %v721_v28 = vpop.f32.mrb[13].mxu0  ;;  %684 = vst [vmem:[%s977_s2 + $0x30] sm:$0xff] %v672_v24   ;;  %v745_v29 = vpop.f32.mrb[13].mxu1 }
 0x10f   :  { %v722_v30 = vadd.f32 %v721_v28, %v720_v26  ;;  %v723_v31 = vpop.f32.mrb[14].mxu0  ;;  %v746_v32 = vadd.f32 %v745_v29, %v744_v27  ;;  %v747_v33 = vpop.f32.mrb[14].mxu1 }
 0x110   :  { %v724_v34 = vpop.f32.mrb[15].mxu0  ;;  %v748_v35 = vpop.f32.mrb[15].mxu1 }
 0x111   :  { %v428_v36 = vadd.f32 %v722_v30, %v427_v21  ;;  %v451_v37 = vmul.f32 %v722_v30, %v722_v30  ;;  %v725_v39 = vadd.f32 %v724_v34, %v723_v31  ;;  %v749_v40 = vadd.f32 %v748_v35, %v747_v33 }
 0x112   :  { %v459_v2 = vmul.f32 %v746_v32, %v746_v32 }
 0x113   :  { %v466_v41 = vadd.f32 %v465_v25, %v451_v37  ;;  %v429_v42 = vadd.f32 %v725_v39, %v428_v36  ;;  %v452_v44 = vmul.f32 %v725_v39, %v725_v39  ;;  %v657_v45 = vpack.c.bf16 %v725_v39, %v722_v30 }
 0x114   :  { %v677_v46 = vpack.c.bf16 %v749_v40, %v746_v32  ;;  %v460_v6 = vmul.f32 %v749_v40, %v749_v40 }
 0x115   :  { %v430_v48 = vadd.f32 %v927_v38, %v429_v42  ;;  %v467_v49 = vadd.f32 %v466_v41, %v452_v44  ;;  %681 = vst [vmem:[%s977_s2 + $0x18] sm:$0xff] %v657_v45  }
 0x116   :  { %685 = vst [vmem:[%s977_s2 + $0x38] sm:$0xff] %v677_v46  }
 0x117   :  { %v431_v51 = vadd.f32 %v929_v43, %v430_v48  ;;  %v468_v52 = vadd.f32 %v467_v49, %v453_v47 }
 0x119   :  { %v469_v54 = vadd.f32 %v468_v52, %v454_v50  ;;  %v432_v38 = vadd.f32 %v939_v56, %v431_v51 }
 0x11b   :  { %v433_v57 = vadd.f32 %v737_v63, %v432_v38  ;;  %v470_v58 = vadd.f32 %v469_v54, %v455_v53 }
 0x11d   :  { %v434_v59 = vadd.f32 %v740_v12, %v433_v57  ;;  %v471_v61 = vadd.f32 %v470_v58, %v456_v55 }
 0x11f   :  { %v472_v62 = vadd.f32 %v471_v61, %v457_v60  ;;  %v435_v0 = vadd.f32 %v743_v19, %v434_v59 }
 0x121   :  { %v473_v3 = vadd.f32 %v472_v62, %v458_v1  ;;  %v436_v4 = vadd.f32 %v746_v32, %v435_v0 }
 0x123   :  { %v474_v43 = vadd.f32 %v473_v3, %v459_v2  ;;  %v437_v5 = vadd.f32 %v749_v40, %v436_v4 }
 0x125   :  { %v438_v7 = vrot.slane %v437_v5, 4  ;;  %v475_v8 = vadd.f32 %v474_v43, %v460_v6 }
 0x127   :  { %v439_v9 = vadd.f32 %v438_v7, %v437_v5  ;;  %v476_v10 = vrot.slane %v475_v8, 4 }
 0x129   :  { %v440_v56 = vrot.slane %v439_v9, 2  ;;  %v477_v11 = vadd.f32 %v476_v10, %v475_v8 }
 0x12b   :  { %v441_v63 = vadd.f32 %v440_v56, %v439_v9  ;;  %v478_v13 = vrot.slane %v477_v11, 2 }
 0x12d   :  { %v442_v14 = vrot.slane %v441_v63, 1  ;;  %v479_v12 = vadd.f32 %v478_v13, %v477_v11 }
 0x12f   :  { %v443_v15 = vadd.f32 %v442_v14, %v441_v63  ;;  %v480_v16 = vrot.slane %v479_v12, 1 }
 0x131   :  { %444 = vst [vmem:[%s978_s3] sm:$0x1] %v443_v15  ;;  %v481_v17 = vadd.f32 %v480_v16, %v479_v12 }
 0x133   :  { %482 = vst [vmem:[%s979_s4] sm:$0x1] %v481_v17 }

// kernel: patchgan_forward.7
= control target key start
LH: loop header
LB: loop body
LE: loop exit
PB: predicated region body
PF: predicated region fallthrough
CT: control target
= control target key end

     0   :  { %s816_s1 = inlined_call_operand.vmem [shape: bf16[512,128], index: 1, kind: input, shape index: {}]   ;;  %s817_s0 = inlined_call_operand.vmem [shape: bf16[32,512], index: 0, kind: input, shape index: {}]   ;;  %s818_s2 = inlined_call_operand.vmem [shape: bf16[32,128], index: 2, kind: output, shape index: {0}]   ;;  %s819_s3 = inlined_call_operand.vmem [shape: f32[1,1,128], index: 3, kind: output, shape index: {1}]   ;;  %s820_s4 = inlined_call_operand.vmem [shape: f32[1,1,128], index: 4, kind: output, shape index: {2}]  }
   0x1   :  { %v615_v0 = vld [vmem:[%s816_s1 + $0x40] sm:$0xff]   ;;  %v619_v4 = vld [vmem:[%s816_s1 + $0x48] sm:$0xff]   ;;  %v623_v8 = vld [vmem:[%s816_s1 + $0x50] sm:$0xff]  }
   0x2   :  { %v616_v1 = vld [vmem:[%s816_s1 + $0xc0] sm:$0xff]   ;;  %559 = vmatprep.subr.bf16.mxu0 %v615_v0  ;;  %v620_v5 = vld [vmem:[%s816_s1 + $0xc8] sm:$0xff]   ;;  %v624_v9 = vld [vmem:[%s816_s1 + $0xd0] sm:$0xff]  }
   0x3   :  { %v617_v2 = vld [vmem:[%s816_s1] sm:$0xff]   ;;  %587 = vmatprep.subr.bf16.mxu1 %v616_v1  ;;  %v621_v6 = vld [vmem:[%s816_s1 + $0x8] sm:$0xff]   ;;  %v625_v10 = vld [vmem:[%s816_s1 + $0x10] sm:$0xff]  }
   0x4   :  { %v618_v3 = vld [vmem:[%s816_s1 + $0x80] sm:$0xff]   ;;  %560 = vmatpush3.bf16.msra.mxu0 %v617_v2  ;;  %v622_v7 = vld [vmem:[%s816_s1 + $0x88] sm:$0xff]   ;;  %v626_v11 = vld [vmem:[%s816_s1 + $0x90] sm:$0xff]  }
   0x5   :  { %588 = vmatpush3.bf16.msra.mxu1 %v618_v3  ;;  %561 = vmatprep.subr.bf16.mxu0 %v619_v4  ;;  %v627_v12 = vld [vmem:[%s816_s1 + $0x58] sm:$0xff]   ;;  %v631_v16 = vld [vmem:[%s816_s1 + $0x60] sm:$0xff]   ;;  %v635_v20 = vld [vmem:[%s816_s1 + $0x68] sm:$0xff]  }
   0x6   :  { %589 = vmatprep.subr.bf16.mxu1 %v620_v5  ;;  %v628_v13 = vld [vmem:[%s816_s1 + $0xd8] sm:$0xff]   ;;  %v632_v17 = vld [vmem:[%s816_s1 + $0xe0] sm:$0xff]   ;;  %v636_v21 = vld [vmem:[%s816_s1 + $0xe8] sm:$0xff]  }
   0x7   :  { %v629_v14 = vld [vmem:[%s816_s1 + $0x18] sm:$0xff]   ;;  %v633_v18 = vld [vmem:[%s816_s1 + $0x20] sm:$0xff]   ;;  %v637_v22 = vld [vmem:[%s816_s1 + $0x28] sm:$0xff]  }
   0x8   :  { %562 = vmatpush3.bf16.msra.mxu0 %v621_v6  ;;  %v630_v15 = vld [vmem:[%s816_s1 + $0x98] sm:$0xff]   ;;  %v634_v19 = vld [vmem:[%s816_s1 + $0xa0] sm:$0xff]   ;;  %v638_v23 = vld [vmem:[%s816_s1 + $0xa8] sm:$0xff]  }
   0x9   :  { %590 = vmatpush3.bf16.msra.mxu1 %v622_v7  ;;  %563 = vmatprep.subr.bf16.mxu0 %v623_v8  ;;  %v639_v24 = vld [vmem:[%s816_s1 + $0x70] sm:$0xff]   ;;  %v643_v28 = vld [vmem:[%s816_s1 + $0x78] sm:$0xff]  }
   0xa   :  { %591 = vmatprep.subr.bf16.mxu1 %v624_v9  ;;  %v640_v25 = vld [vmem:[%s816_s1 + $0xf0] sm:$0xff]   ;;  %v644_v29 = vld [vmem:[%s816_s1 + $0xf8] sm:$0xff]  }
   0xb   :  { %v641_v26 = vld [vmem:[%s816_s1 + $0x30] sm:$0xff]   ;;  %v645_v30 = vld [vmem:[%s816_s1 + $0x38] sm:$0xff]  }
   0xc   :  { %564 = vmatpush3.bf16.msra.mxu0 %v625_v10  ;;  %v642_v27 = vld [vmem:[%s816_s1 + $0xb0] sm:$0xff]   ;;  %v646_v31 = vld [vmem:[%s816_s1 + $0xb8] sm:$0xff]  }
   0xd   :  { %592 = vmatpush3.bf16.msra.mxu1 %v626_v11  ;;  %565 = vmatprep.subr.bf16.mxu0 %v627_v12  ;;  %v647_v32 = vld [vmem:[%s817_s0] ss:$16 sps:$4 sm:$0xff]   ;;  %v649_v33 = vld [vmem:[%s817_s0 + $0x4] ss:$16 sps:$4 sm:$0xff]   ;;  %v650_v34 = vld [vmem:[%s817_s0 + $0x8] ss:$16 sps:$4 sm:$0xff]  }
   0xe   :  { %593 = vmatprep.subr.bf16.mxu1 %v628_v13  ;;  %v652_v35 = vld [vmem:[%s817_s0 + $0xc] ss:$16 sps:$4 sm:$0xff]   ;;  %363 = vmatprep.mubr.bf16.mxu0 %v649_v33  ;;  %v653_v36 = vld [vmem:[%s817_s0 + $0x24] ss:$16 sps:$4 sm:$0xff]   ;;  %v657_v38 = vld [vmem:[%s817_s0 + $0x20] ss:$16 sps:$4 sm:$0xff]  }
   0xf   :  { %412 = vmatprep.mubr.bf16.mxu1 %v652_v35  ;;  %v655_v37 = vld [vmem:[%s817_s0 + $0x2c] ss:$16 sps:$4 sm:$0xff]   ;;  %v658_v39 = vld [vmem:[%s817_s0 + $0x28] ss:$16 sps:$4 sm:$0xff]  }
  0x10   :  { %566 = vmatpush3.bf16.msra.mxu0 %v629_v14 }
  0x11   :  { %594 = vmatpush3.bf16.msra.mxu1 %v630_v15  ;;  %567 = vmatprep.subr.bf16.mxu0 %v631_v16 }
  0x12   :  { %595 = vmatprep.subr.bf16.mxu1 %v632_v17 }
  0x14   :  { %568 = vmatpush3.bf16.msra.mxu0 %v633_v18 }
  0x15   :  { %596 = vmatpush3.bf16.msra.mxu1 %v634_v19  ;;  %569 = vmatprep.subr.bf16.mxu0 %v635_v20 }
  0x16   :  { %597 = vmatprep.subr.bf16.mxu1 %v636_v21 }
  0x18   :  { %570 = vmatpush3.bf16.msra.mxu0 %v637_v22 }
  0x19   :  { %598 = vmatpush3.bf16.msra.mxu1 %v638_v23  ;;  %571 = vmatprep.subr.bf16.mxu0 %v639_v24 }
  0x1a   :  { %599 = vmatprep.subr.bf16.mxu1 %v640_v25 }
  0x1c   :  { %572 = vmatpush3.bf16.msra.mxu0 %v641_v26 }
  0x1d   :  { %600 = vmatpush3.bf16.msra.mxu1 %v642_v27  ;;  %573 = vmatprep.subr.bf16.mxu0 %v643_v28 }
  0x1e   :  { %601 = vmatprep.subr.bf16.mxu1 %v644_v29 }
  0x20   :  { %574 = vmatpush3.bf16.msra.mxu0 %v645_v30 }
  0x21   :  { %602 = vmatpush3.bf16.msra.mxu1 %v646_v31 }
  0x23   :  { %364 = vmatmul.mubr.bf16.vlgmr.msra.gmra.mrb[0].mxu0 %v647_v32 }
  0x24   :  { %413 = vmatmul.mubr.bf16.vlgmr.msra.gmra.mrb[0].mxu1 %v650_v34  ;;  %371 = vmatprep.mubr.bf16.mxu0 %v653_v36 }
  0x25   :  { %420 = vmatprep.mubr.bf16.mxu1 %v655_v37 }
  0x2b   :  { %372 = vmatmul.mubr.bf16.gmra.mrb[4].mxu0 %v657_v38 }
  0x2c   :  { %421 = vmatmul.mubr.bf16.gmra.mrb[4].mxu1 %v658_v39 }
  0xf6   :  { %v575_v40 = vpop.f32.mrb[0].mxu0 }
  0xf7   :  { %v603_v41 = vpop.f32.mrb[0].mxu1  ;;  %v576_v42 = vpop.f32.mrb[1].mxu0 }
  0xf8   :  { %v577_v43 = vadd.f32 %v576_v42, %v575_v40  ;;  %v604_v44 = vpop.f32.mrb[1].mxu1  ;;  %v578_v45 = vpop.f32.mrb[2].mxu0 }
  0xf9   :  { %v605_v46 = vadd.f32 %v604_v44, %v603_v41  ;;  %v606_v47 = vpop.f32.mrb[2].mxu1  ;;  %v579_v48 = vpop.f32.mrb[3].mxu0 }
  0xfa   :  { %v580_v49 = vadd.f32 %v579_v48, %v578_v45  ;;  %v607_v50 = vpop.f32.mrb[3].mxu1 }
  0xfb   :  { %v415_v51 = vadd.f32 %v605_v46, %v577_v43  ;;  %v608_v52 = vadd.f32 %v607_v50, %v606_v47 }
  0xfd   :  { %v418_v53 = vadd.f32 %v608_v52, %v580_v49  ;;  %v454_v55 = vmul.f32 %v415_v51, %v415_v51 }
  0xfe   :  { %v581_v54 = vpop.f32.mrb[4].mxu0 }
  0xff   :  { %v444_v56 = vadd.f32 %v418_v53, %v415_v51  ;;  %v455_v57 = vmul.f32 %v418_v53, %v418_v53  ;;  %v551_v58 = vpack.c.bf16 %v418_v53, %v415_v51  ;;  %v609_v59 = vpop.f32.mrb[4].mxu1  ;;  %v582_v60 = vpop.f32.mrb[5].mxu0 }
 0x100   :  { %v583_v61 = vadd.f32 %v582_v60, %v581_v54  ;;  %v610_v62 = vpop.f32.mrb[5].mxu1  ;;  %v584_v63 = vpop.f32.mrb[6].mxu0 }
 0x101   :  { %v458_v0 = vadd.f32 %v455_v57, %v454_v55  ;;  %552 = vst [vmem:[%s818_s2] sm:$0xff] %v551_v58   ;;  %v611_v1 = vadd.f32 %v610_v62, %v609_v59  ;;  %v612_v2 = vpop.f32.mrb[6].mxu1  ;;  %v585_v3 = vpop.f32.mrb[7].mxu0 }
 0x102   :  { %v586_v4 = vadd.f32 %v585_v3, %v584_v63  ;;  %v613_v5 = vpop.f32.mrb[7].mxu1 }
 0x103   :  { %v423_v6 = vadd.f32 %v611_v1, %v583_v61  ;;  %v614_v7 = vadd.f32 %v613_v5, %v612_v2 }
 0x105   :  { %v445_v8 = vadd.f32 %v444_v56, %v423_v6  ;;  %v456_v9 = vmul.f32 %v423_v6, %v423_v6  ;;  %v426_v10 = vadd.f32 %v614_v7, %v586_v4 }
 0x107   :  { %v459_v11 = vadd.f32 %v458_v0, %v456_v9  ;;  %v446_v12 = vadd.f32 %v445_v8, %v426_v10  ;;  %v457_v13 = vmul.f32 %v426_v10, %v426_v10  ;;  %v556_v14 = vpack.c.bf16 %v426_v10, %v423_v6 }
 0x109   :  { %v447_v15 = vrot.slane %v446_v12, 4  ;;  %v460_v16 = vadd.f32 %v459_v11, %v457_v13  ;;  %558 = vst [vmem:[%s818_s2 + $0x8] sm:$0xff] %v556_v14  }
 0x10b   :  { %v448_v17 = vadd.f32 %v447_v15, %v446_v12  ;;  %v461_v18 = vrot.slane %v460_v16, 4 }
 0x10d   :  { %v449_v19 = vrot.slane %v448_v17, 2  ;;  %v462_v20 = vadd.f32 %v461_v18, %v460_v16 }
 0x10f   :  { %v450_v21 = vadd.f32 %v449_v19, %v448_v17  ;;  %v463_v22 = vrot.slane %v462_v20, 2 }
 0x111   :  { %v451_v23 = vrot.slane %v450_v21, 1  ;;  %v464_v24 = vadd.f32 %v463_v22, %v462_v20 }
 0x113   :  { %v452_v25 = vadd.f32 %v451_v23, %v450_v21  ;;  %v465_v26 = vrot.slane %v464_v24, 1 }
 0x115   :  { %453 = vst [vmem:[%s819_s3] sm:$0x1] %v452_v25  ;;  %v466_v27 = vadd.f32 %v465_v26, %v464_v24 }
 0x117   :  { %467 = vst [vmem:[%s820_s4] sm:$0x1] %v466_v27 }

// kernel: patchgan_forward.8
= control target key start
LH: loop header
LB: loop body
LE: loop exit
PB: predicated region body
PF: predicated region fallthrough
CT: control target
= control target key end

     0   :  { %s1454_s1 = inlined_call_operand.vmem [shape: bf16[1024,128], index: 1, kind: input, shape index: {}]   ;;  %s1455_s0 = inlined_call_operand.vmem [shape: bf16[32,1024], index: 0, kind: input, shape index: {}]   ;;  %s1456_s2 = inlined_call_operand.vmem [shape: bf16[32,128], index: 2, kind: output, shape index: {0}]   ;;  %s1457_s3 = inlined_call_operand.vmem [shape: f32[1,1,128], index: 3, kind: output, shape index: {1}]   ;;  %s1458_s4 = inlined_call_operand.vmem [shape: f32[1,1,128], index: 4, kind: output, shape index: {2}]  }
   0x1   :  { %v1113_v0 = vld [vmem:[%s1454_s1 + $0x40] sm:$0xff]   ;;  %v1117_v4 = vld [vmem:[%s1454_s1 + $0x48] sm:$0xff]   ;;  %v1121_v8 = vld [vmem:[%s1454_s1 + $0x50] sm:$0xff]  }
   0x2   :  { %v1114_v1 = vld [vmem:[%s1454_s1 + $0xc0] sm:$0xff]   ;;  %1001 = vmatprep.subr.bf16.mxu0 %v1113_v0  ;;  %v1118_v5 = vld [vmem:[%s1454_s1 + $0xc8] sm:$0xff]   ;;  %v1122_v9 = vld [vmem:[%s1454_s1 + $0xd0] sm:$0xff]  }
   0x3   :  { %v1115_v2 = vld [vmem:[%s1454_s1] sm:$0xff]   ;;  %1029 = vmatprep.subr.bf16.mxu1 %v1114_v1  ;;  %v1119_v6 = vld [vmem:[%s1454_s1 + $0x8] sm:$0xff]   ;;  %v1123_v10 = vld [vmem:[%s1454_s1 + $0x10] sm:$0xff]  }
   0x4   :  { %v1116_v3 = vld [vmem:[%s1454_s1 + $0x80] sm:$0xff]   ;;  %1002 = vmatpush3.bf16.msra.mxu0 %v1115_v2  ;;  %v1120_v7 = vld [vmem:[%s1454_s1 + $0x88] sm:$0xff]   ;;  %v1124_v11 = vld [vmem:[%s1454_s1 + $0x90] sm:$0xff]  }
   0x5   :  { %1030 = vmatpush3.bf16.msra.mxu1 %v1116_v3  ;;  %1003 = vmatprep.subr.bf16.mxu0 %v1117_v4  ;;  %v1125_v12 = vld [vmem:[%s1454_s1 + $0x58] sm:$0xff]   ;;  %v1129_v16 = vld [vmem:[%s1454_s1 + $0x60] sm:$0xff]   ;;  %v1133_v20 = vld [vmem:[%s1454_s1 + $0x68] sm:$0xff]  }
   0x6   :  { %1031 = vmatprep.subr.bf16.mxu1 %v1118_v5  ;;  %v1126_v13 = vld [vmem:[%s1454_s1 + $0xd8] sm:$0xff]   ;;  %v1130_v17 = vld [vmem:[%s1454_s1 + $0xe0] sm:$0xff]   ;;  %v1134_v21 = vld [vmem:[%s1454_s1 + $0xe8] sm:$0xff]  }
   0x7   :  { %v1127_v14 = vld [vmem:[%s1454_s1 + $0x18] sm:$0xff]   ;;  %v1131_v18 = vld [vmem:[%s1454_s1 + $0x20] sm:$0xff]   ;;  %v1135_v22 = vld [vmem:[%s1454_s1 + $0x28] sm:$0xff]  }
   0x8   :  { %1004 = vmatpush3.bf16.msra.mxu0 %v1119_v6  ;;  %v1128_v15 = vld [vmem:[%s1454_s1 + $0x98] sm:$0xff]   ;;  %v1132_v19 = vld [vmem:[%s1454_s1 + $0xa0] sm:$0xff]   ;;  %v1136_v23 = vld [vmem:[%s1454_s1 + $0xa8] sm:$0xff]  }
   0x9   :  { %1032 = vmatpush3.bf16.msra.mxu1 %v1120_v7  ;;  %1005 = vmatprep.subr.bf16.mxu0 %v1121_v8  ;;  %v1137_v24 = vld [vmem:[%s1454_s1 + $0x70] sm:$0xff]   ;;  %v1141_v28 = vld [vmem:[%s1454_s1 + $0x78] sm:$0xff]   ;;  %v27_v32 = vld [vmem:[%s1455_s0] sm:$0xff] }
   0xa   :  { %1033 = vmatprep.subr.bf16.mxu1 %v1122_v9  ;;  %v1138_v25 = vld [vmem:[%s1454_s1 + $0xf0] sm:$0xff]   ;;  %v1142_v29 = vld [vmem:[%s1454_s1 + $0xf8] sm:$0xff]   ;;  %v31_v33 = vld [vmem:[%s1455_s0 + $0x20] sm:$0xff] }
   0xb   :  { %v1139_v26 = vld [vmem:[%s1454_s1 + $0x30] sm:$0xff]   ;;  %v1143_v30 = vld [vmem:[%s1454_s1 + $0x38] sm:$0xff]   ;;  %v28_v34 = vld [vmem:[%s1455_s0 + $0x8] sm:$0xff]  ;;  %v902_v35 = vcombine.low %v27_v32, %v31_v33  ;;  %v903_v36 = vcombine.high %v27_v32, %v31_v33 }
   0xc   :  { %1006 = vmatpush3.bf16.msra.mxu0 %v1123_v10  ;;  %v1140_v27 = vld [vmem:[%s1454_s1 + $0xb0] sm:$0xff]   ;;  %v1144_v31 = vld [vmem:[%s1454_s1 + $0xb8] sm:$0xff]   ;;  %v32_v37 = vld [vmem:[%s1455_s0 + $0x28] sm:$0xff] }
   0xd   :  { %1034 = vmatpush3.bf16.msra.mxu1 %v1124_v11  ;;  %1007 = vmatprep.subr.bf16.mxu0 %v1125_v12  ;;  %v904_v38 = vcombine.low %v28_v34, %v32_v37  ;;  %v905_v39 = vcombine.high %v28_v34, %v32_v37  ;;  %v1145_v40 = vld [vmem:[%s1454_s1 + $0x140] sm:$0xff]   ;;  %v1149_v44 = vld [vmem:[%s1454_s1 + $0x148] sm:$0xff]   ;;  %v1153_v48 = vld [vmem:[%s1454_s1 + $0x150] sm:$0xff]  }
   0xe   :  { %1035 = vmatprep.subr.bf16.mxu1 %v1126_v13  ;;  %667 = vmatprep.mubr.bf16.mxu0 %v903_v36  ;;  %v1146_v41 = vld [vmem:[%s1454_s1 + $0x1c0] sm:$0xff]   ;;  %v1150_v45 = vld [vmem:[%s1454_s1 + $0x1c8] sm:$0xff]   ;;  %v1154_v49 = vld [vmem:[%s1454_s1 + $0x1d0] sm:$0xff]  }
   0xf   :  { %716 = vmatprep.mubr.bf16.mxu1 %v905_v39  ;;  %v1147_v42 = vld [vmem:[%s1454_s1 + $0x100] sm:$0xff]   ;;  %v1151_v46 = vld [vmem:[%s1454_s1 + $0x108] sm:$0xff]   ;;  %v1155_v50 = vld [vmem:[%s1454_s1 + $0x110] sm:$0xff]  }
  0x10   :  { %1008 = vmatpush3.bf16.msra.mxu0 %v1127_v14  ;;  %v1148_v43 = vld [vmem:[%s1454_s1 + $0x180] sm:$0xff]   ;;  %v1152_v47 = vld [vmem:[%s1454_s1 + $0x188] sm:$0xff]   ;;  %v1156_v51 = vld [vmem:[%s1454_s1 + $0x190] sm:$0xff]  }
  0x11   :  { %1036 = vmatpush3.bf16.msra.mxu1 %v1128_v15  ;;  %1009 = vmatprep.subr.bf16.mxu0 %v1129_v16  ;;  %v1157_v52 = vld [vmem:[%s1454_s1 + $0x158] sm:$0xff]   ;;  %v1161_v56 = vld [vmem:[%s1454_s1 + $0x160] sm:$0xff]   ;;  %v36_v63 = vld [vmem:[%s1455_s0 + $0x48] sm:$0xff] }
  0x12   :  { %1037 = vmatprep.subr.bf16.mxu1 %v1130_v17  ;;  %v1158_v53 = vld [vmem:[%s1454_s1 + $0x1d8] sm:$0xff]   ;;  %v1162_v57 = vld [vmem:[%s1454_s1 + $0x1e0] sm:$0xff]   ;;  %v40_v0 = vld [vmem:[%s1455_s0 + $0x68] sm:$0xff] }
  0x13   :  { %v1159_v54 = vld [vmem:[%s1454_s1 + $0x118] sm:$0xff]   ;;  %v1163_v58 = vld [vmem:[%s1454_s1 + $0x120] sm:$0xff]   ;;  %v913_v2 = vcombine.high %v36_v63, %v40_v0  ;;  %v1165_v3 = vld [vmem:[%s1454_s1 + $0x168] sm:$0xff]   ;;  %v912_v4 = vcombine.low %v36_v63, %v40_v0 }
  0x14   :  { %1010 = vmatpush3.bf16.msra.mxu0 %v1131_v18  ;;  %v1160_v55 = vld [vmem:[%s1454_s1 + $0x198] sm:$0xff]   ;;  %v1164_v59 = vld [vmem:[%s1454_s1 + $0x1a0] sm:$0xff]   ;;  %v1166_v5 = vld [vmem:[%s1454_s1 + $0x1e8] sm:$0xff]  }
  0x15   :  { %1038 = vmatpush3.bf16.msra.mxu1 %v1132_v19  ;;  %1011 = vmatprep.subr.bf16.mxu0 %v1133_v20  ;;  %v35_v60 = vld [vmem:[%s1455_s0 + $0x40] sm:$0xff]  ;;  %v1167_v6 = vld [vmem:[%s1454_s1 + $0x128] sm:$0xff]   ;;  %v1169_v8 = vld [vmem:[%s1454_s1 + $0x170] sm:$0xff]  }
  0x16   :  { %1039 = vmatprep.subr.bf16.mxu1 %v1134_v21  ;;  %v39_v61 = vld [vmem:[%s1455_s0 + $0x60] sm:$0xff]  ;;  %v1168_v7 = vld [vmem:[%s1454_s1 + $0x1a8] sm:$0xff]   ;;  %v1170_v9 = vld [vmem:[%s1454_s1 + $0x1f0] sm:$0xff]  }
  0x17   :  { %v911_v62 = vcombine.high %v35_v60, %v39_v61  ;;  %v910_v1 = vcombine.low %v35_v60, %v39_v61  ;;  %v1171_v10 = vld [vmem:[%s1454_s1 + $0x130] sm:$0xff]   ;;  %v1173_v12 = vld [vmem:[%s1454_s1 + $0x178] sm:$0xff]  }
  0x18   :  { %1012 = vmatpush3.bf16.msra.mxu0 %v1135_v22  ;;  %v1172_v11 = vld [vmem:[%s1454_s1 + $0x1b0] sm:$0xff]   ;;  %v1174_v13 = vld [vmem:[%s1454_s1 + $0x1f8] sm:$0xff]  }
  0x19   :  { %1040 = vmatpush3.bf16.msra.mxu1 %v1136_v23  ;;  %1013 = vmatprep.subr.bf16.mxu0 %v1137_v24  ;;  %v1175_v14 = vld [vmem:[%s1454_s1 + $0x138] sm:$0xff]   ;;  %v29_v16 = vld [vmem:[%s1455_s0 + $0x10] sm:$0xff] }
  0x1a   :  { %1041 = vmatprep.subr.bf16.mxu1 %v1138_v25  ;;  %v1176_v15 = vld [vmem:[%s1454_s1 + $0x1b8] sm:$0xff]   ;;  %v33_v17 = vld [vmem:[%s1455_s0 + $0x30] sm:$0xff] }
  0x1b   :  { %v30_v18 = vld [vmem:[%s1455_s0 + $0x18] sm:$0xff]  ;;  %v906_v20 = vcombine.low %v29_v16, %v33_v17  ;;  %v907_v21 = vcombine.high %v29_v16, %v33_v17  ;;  %v37_v24 = vld [vmem:[%s1455_s0 + $0x50] sm:$0xff] }
  0x1c   :  { %1014 = vmatpush3.bf16.msra.mxu0 %v1139_v26  ;;  %v34_v19 = vld [vmem:[%s1455_s0 + $0x38] sm:$0xff]  ;;  %v41_v25 = vld [vmem:[%s1455_s0 + $0x70] sm:$0xff] }
  0x1d   :  { %1042 = vmatpush3.bf16.msra.mxu1 %v1140_v27  ;;  %1015 = vmatprep.subr.bf16.mxu0 %v1141_v28  ;;  %v908_v22 = vcombine.low %v30_v18, %v34_v19  ;;  %v909_v23 = vcombine.high %v30_v18, %v34_v19  ;;  %v38_v26 = vld [vmem:[%s1455_s0 + $0x58] sm:$0xff]  ;;  %v915_v27 = vcombine.high %v37_v24, %v41_v25 }
  0x1e   :  { %1043 = vmatprep.subr.bf16.mxu1 %v1142_v29  ;;  %v42_v28 = vld [vmem:[%s1455_s0 + $0x78] sm:$0xff] }
  0x1f   :  { %v917_v29 = vcombine.high %v38_v26, %v42_v28 }
  0x20   :  { %1016 = vmatpush3.bf16.msra.mxu0 %v1143_v30  ;;  %v914_v30 = vcombine.low %v37_v24, %v41_v25 }
  0x21   :  { %1044 = vmatpush3.bf16.msra.mxu1 %v1144_v31  ;;  %1057 = vmatprep.subr.bf16.mxu0 %v1145_v40  ;;  %v916_v31 = vcombine.low %v38_v26, %v42_v28 }
  0x22   :  { %1085 = vmatprep.subr.bf16.mxu1 %v1146_v41 }
  0x23   :  { %668 = vmatmul.mubr.bf16.vlgmr.msra.gmra.mrb[0].mxu0 %v902_v35 }
  0x24   :  { %717 = vmatmul.mubr.bf16.vlgmr.msra.gmra.mrb[0].mxu1 %v904_v38  ;;  %1058 = vmatpush3.bf16.msra.mxu0 %v1147_v42 }
  0x25   :  { %1086 = vmatpush3.bf16.msra.mxu1 %v1148_v43  ;;  %1059 = vmatprep.subr.bf16.mxu0 %v1149_v44 }
  0x26   :  { %1087 = vmatprep.subr.bf16.mxu1 %v1150_v45  ;;  %675 = vmatprep.mubr.bf16.mxu0 %v911_v62 }
  0x27   :  { %724 = vmatprep.mubr.bf16.mxu1 %v913_v2 }
  0x28   :  { %1060 = vmatpush3.bf16.msra.mxu0 %v1151_v46 }
  0x29   :  { %1088 = vmatpush3.bf16.msra.mxu1 %v1152_v47  ;;  %1061 = vmatprep.subr.bf16.mxu0 %v1153_v48 }
  0x2a   :  { %1089 = vmatprep.subr.bf16.mxu1 %v1154_v49 }
  0x2b   :  { %676 = vmatmul.mubr.bf16.gmra.mrb[4].mxu0 %v910_v1 }
  0x2c   :  { %1062 = vmatpush3.bf16.msra.mxu0 %v1155_v50  ;;  %725 = vmatmul.mubr.bf16.gmra.mrb[4].mxu1 %v912_v4 }
  0x2d   :  { %1090 = vmatpush3.bf16.msra.mxu1 %v1156_v51  ;;  %1063 = vmatprep.subr.bf16.mxu0 %v1157_v52 }
  0x2e   :  { %1091 = vmatprep.subr.bf16.mxu1 %v1158_v53  ;;  %765 = vmatprep.mubr.bf16.mxu0 %v907_v21 }
  0x2f   :  { %814 = vmatprep.mubr.bf16.mxu1 %v909_v23 }
  0x30   :  { %1064 = vmatpush3.bf16.msra.mxu0 %v1159_v54 }
  0x31   :  { %1092 = vmatpush3.bf16.msra.mxu1 %v1160_v55  ;;  %1065 = vmatprep.subr.bf16.mxu0 %v1161_v56 }
  0x32   :  { %1093 = vmatprep.subr.bf16.mxu1 %v1162_v57 }
  0x34   :  { %1066 = vmatpush3.bf16.msra.mxu0 %v1163_v58 }
  0x35   :  { %1094 = vmatpush3.bf16.msra.mxu1 %v1164_v59  ;;  %1067 = vmatprep.subr.bf16.mxu0 %v1165_v3 }
  0x36   :  { %1095 = vmatprep.subr.bf16.mxu1 %v1166_v5 }
  0x38   :  { %1068 = vmatpush3.bf16.msra.mxu0 %v1167_v6 }
  0x39   :  { %1096 = vmatpush3.bf16.msra.mxu1 %v1168_v7  ;;  %1069 = vmatprep.subr.bf16.mxu0 %v1169_v8 }
  0x3a   :  { %1097 = vmatprep.subr.bf16.mxu1 %v1170_v9 }
  0x3c   :  { %1070 = vmatpush3.bf16.msra.mxu0 %v1171_v10 }
  0x3d   :  { %1098 = vmatpush3.bf16.msra.mxu1 %v1172_v11  ;;  %1071 = vmatprep.subr.bf16.mxu0 %v1173_v12 }
  0x3e   :  { %1099 = vmatprep.subr.bf16.mxu1 %v1174_v13 }
  0x40   :  { %1072 = vmatpush3.bf16.msra.mxu0 %v1175_v14 }
  0x41   :  { %1100 = vmatpush3.bf16.msra.mxu1 %v1176_v15 }
  0x43   :  { %766 = vmatmul.mubr.bf16.vlgmr.msra.gmra.mrb[8].mxu0 %v906_v20 }
  0x44   :  { %815 = vmatmul.mubr.bf16.vlgmr.msra.gmra.mrb[8].mxu1 %v908_v22  ;;  %773 = vmatprep.mubr.bf16.mxu0 %v915_v27 }
  0x45   :  { %822 = vmatprep.mubr.bf16.mxu1 %v917_v29 }
  0x4b   :  { %774 = vmatmul.mubr.bf16.gmra.mrb[12].mxu0 %v914_v30 }
  0x4c   :  { %823 = vmatmul.mubr.bf16.gmra.mrb[12].mxu1 %v916_v31 }
  0xf6   :  { %v1017_v32 = vpop.f32.mrb[0].mxu0 }
  0xf7   :  { %v1045_v33 = vpop.f32.mrb[0].mxu1  ;;  %v1018_v34 = vpop.f32.mrb[1].mxu0 }
  0xf8   :  { %v1019_v35 = vadd.f32 %v1018_v34, %v1017_v32  ;;  %v1046_v36 = vpop.f32.mrb[1].mxu1  ;;  %v1020_v37 = vpop.f32.mrb[2].mxu0 }
  0xf9   :  { %v1047_v38 = vadd.f32 %v1046_v36, %v1045_v33  ;;  %v1048_v39 = vpop.f32.mrb[2].mxu1  ;;  %v1021_v40 = vpop.f32.mrb[3].mxu0 }
  0xfa   :  { %v1022_v41 = vadd.f32 %v1021_v40, %v1020_v37  ;;  %v1049_v42 = vpop.f32.mrb[3].mxu1 }
  0xfb   :  { %v719_v43 = vadd.f32 %v1047_v38, %v1019_v35  ;;  %v1050_v44 = vadd.f32 %v1049_v42, %v1048_v39 }
  0xfd   :  { %v722_v45 = vadd.f32 %v1050_v44, %v1022_v41 }
  0xfe   :  { %v1023_v46 = vpop.f32.mrb[4].mxu0 }
  0xff   :  { %v1051_v47 = vpop.f32.mrb[4].mxu1  ;;  %v1024_v48 = vpop.f32.mrb[5].mxu0 }
 0x100   :  { %v1025_v49 = vadd.f32 %v1024_v48, %v1023_v46  ;;  %v1052_v50 = vpop.f32.mrb[5].mxu1  ;;  %v1026_v51 = vpop.f32.mrb[6].mxu0 }
 0x101   :  { %v1053_v52 = vadd.f32 %v1052_v50, %v1051_v47  ;;  %v1054_v53 = vpop.f32.mrb[6].mxu1  ;;  %v1027_v54 = vpop.f32.mrb[7].mxu0 }
 0x102   :  { %v1028_v55 = vadd.f32 %v1027_v54, %v1026_v51  ;;  %v1055_v56 = vpop.f32.mrb[7].mxu1 }
 0x103   :  { %v727_v57 = vadd.f32 %v1053_v52, %v1025_v49  ;;  %v1056_v58 = vadd.f32 %v1055_v56, %v1054_v53 }
 0x105   :  { %v730_v59 = vadd.f32 %v1056_v58, %v1028_v55 }
 0x116   :  { %v1073_v60 = vpop.f32.mrb[8].mxu0 }
 0x117   :  { %v1101_v61 = vpop.f32.mrb[8].mxu1  ;;  %v1074_v62 = vpop.f32.mrb[9].mxu0 }
 0x118   :  { %v1102_v63 = vpop.f32.mrb[9].mxu1  ;;  %v1075_v0 = vadd.f32 %v1074_v62, %v1073_v60  ;;  %v1076_v2 = vpop.f32.mrb[10].mxu0 }
 0x119   :  { %v1103_v1 = vadd.f32 %v1102_v63, %v1101_v61  ;;  %v1104_v3 = vpop.f32.mrb[10].mxu1  ;;  %v1077_v4 = vpop.f32.mrb[11].mxu0 }
 0x11a   :  { %v1105_v5 = vpop.f32.mrb[11].mxu1  ;;  %v768_v6 = vadd.f32 %v1075_v0, %v719_v43  ;;  %v1078_v7 = vadd.f32 %v1077_v4, %v1076_v2 }
 0x11b   :  { %v1106_v8 = vadd.f32 %v1105_v5, %v1104_v3 }
 0x11c   :  { %v817_v9 = vadd.f32 %v1103_v1, %v768_v6  ;;  %v771_v10 = vadd.f32 %v1078_v7, %v722_v45 }
 0x11e   :  { %v820_v11 = vadd.f32 %v1106_v8, %v771_v10  ;;  %v1079_v12 = vpop.f32.mrb[12].mxu0  ;;  %v856_v14 = vmul.f32 %v817_v9, %v817_v9 }
 0x11f   :  { %v1107_v13 = vpop.f32.mrb[12].mxu1  ;;  %v1080_v15 = vpop.f32.mrb[13].mxu0 }
 0x120   :  { %v1108_v16 = vpop.f32.mrb[13].mxu1  ;;  %v846_v17 = vadd.f32 %v820_v11, %v817_v9  ;;  %v857_v18 = vmul.f32 %v820_v11, %v820_v11  ;;  %v993_v19 = vpack.c.bf16 %v820_v11, %v817_v9  ;;  %v1081_v20 = vadd.f32 %v1080_v15, %v1079_v12  ;;  %v1082_v21 = vpop.f32.mrb[14].mxu0 }
 0x121   :  { %v1110_v22 = vpop.f32.mrb[14].mxu1  ;;  %v1109_v23 = vadd.f32 %v1108_v16, %v1107_v13  ;;  %v1083_v24 = vpop.f32.mrb[15].mxu0 }
 0x122   :  { %v1111_v25 = vpop.f32.mrb[15].mxu1  ;;  %v860_v26 = vadd.f32 %v857_v18, %v856_v14  ;;  %994 = vst [vmem:[%s1456_s2] sm:$0xff] %v993_v19   ;;  %v776_v27 = vadd.f32 %v1081_v20, %v727_v57  ;;  %v1084_v28 = vadd.f32 %v1083_v24, %v1082_v21 }
 0x123   :  { %v1112_v29 = vadd.f32 %v1111_v25, %v1110_v22 }
 0x124   :  { %v825_v30 = vadd.f32 %v1109_v23, %v776_v27  ;;  %v779_v31 = vadd.f32 %v1084_v28, %v730_v59 }
 0x126   :  { %v847_v32 = vadd.f32 %v846_v17, %v825_v30  ;;  %v858_v33 = vmul.f32 %v825_v30, %v825_v30  ;;  %v828_v34 = vadd.f32 %v1112_v29, %v779_v31 }
 0x128   :  { %v861_v35 = vadd.f32 %v860_v26, %v858_v33  ;;  %v848_v36 = vadd.f32 %v847_v32, %v828_v34  ;;  %v859_v37 = vmul.f32 %v828_v34, %v828_v34  ;;  %v998_v38 = vpack.c.bf16 %v828_v34, %v825_v30 }
 0x12a   :  { %v849_v39 = vrot.slane %v848_v36, 4  ;;  %v862_v40 = vadd.f32 %v861_v35, %v859_v37  ;;  %1000 = vst [vmem:[%s1456_s2 + $0x8] sm:$0xff] %v998_v38  }
 0x12c   :  { %v850_v41 = vadd.f32 %v849_v39, %v848_v36  ;;  %v863_v42 = vrot.slane %v862_v40, 4 }
 0x12e   :  { %v851_v43 = vrot.slane %v850_v41, 2  ;;  %v864_v44 = vadd.f32 %v863_v42, %v862_v40 }
 0x130   :  { %v852_v45 = vadd.f32 %v851_v43, %v850_v41  ;;  %v865_v46 = vrot.slane %v864_v44, 2 }
 0x132   :  { %v853_v47 = vrot.slane %v852_v45, 1  ;;  %v866_v48 = vadd.f32 %v865_v46, %v864_v44 }
 0x134   :  { %v854_v49 = vadd.f32 %v853_v47, %v852_v45  ;;  %v867_v50 = vrot.slane %v866_v48, 1 }
 0x136   :  { %855 = vst [vmem:[%s1457_s3] sm:$0x1] %v854_v49  ;;  %v868_v51 = vadd.f32 %v867_v50, %v866_v48 }
 0x138   :  { %869 = vst [vmem:[%s1458_s4] sm:$0x1] %v868_v51 }

// kernel: patchgan_forward.9
= control target key start
LH: loop header
LB: loop body
LE: loop exit
PB: predicated region body
PF: predicated region fallthrough
CT: control target
= control target key end

     0   :  { %s1497_s12 = smov 0   ;;  %s1499_s13 = smov 0   ;;  %s1673_s0 = inlined_call_operand.vmem [shape: bf16[16,2048], index: 0, kind: input, shape index: {}]   ;;  %s1674_s1 = inlined_call_operand.vmem [shape: bf16[2048,128], index: 1, kind: input, shape index: {}]   ;;  %s1675_s2 = inlined_call_operand.vmem [shape: f32[1,128], index: 2, kind: input, shape index: {}]   ;;  %s1676_s3 = inlined_call_operand.vmem [shape: f32[16,128], index: 3, kind: output, shape index: {}]  }
   0x1   :  { %s1501_s14 = smov 0   ;;  %s1503_s15 = smov 0  }
   0x2   :  { %s1505_s16 = smov 0  }
   0x3 LB: > { %s25_s17 = sadd.s32 1, %s1470_s15  ;;  %p48_p1 = scmp.ne.s32.totalorder %s1462_s13, %s1458_s12  ;;  %s1474_s16 = sphi %s1505_s16, %s13_s16   ;;  %s1470_s15 = sphi %s1503_s15, %s1680_s15   ;;  %s1466_s14 = sphi %s1501_s14, %s1679_s14   ;;  %s1462_s13 = sphi %s1499_s13, %s1678_s13   ;;  %s1458_s12 = sphi %s1497_s12, %s1677_s12  }
   0x4   : > { %p26_p0 = scmp.ge.s32.totalorder %s25_s17, 2  ;;  %p49_p2 = scmp.eq.s32.totalorder %s1474_s16, 0 }
   0x5   : > { %s41_s19 = sadd.s32 1, %s1462_s13  ;;  %p1155_p5 = scmp.ge.s32.totalorder %s1474_s16, 2 }
   0x6   : > { %s1682_s17 = smov (%p26_p0, %s25_s17), 0  ;;  %p50_p3 = por %p49_p2, %p48_p1 }
   0x7   : > { %s37_s18 = ssub.s32 %s1470_s15, %s1682_s17  ;;  %162 = sbr.rel (%p1155_p5) target bundleno = 22 (0x16), region = 20 }
   0x8   : > { %p39_p4 = scmp.eq.s32.totalorder %s37_s18, 0 }
   0xa   : > { %s1532_s20 = scalar_select %p39_p4, %s1462_s13, %s41_s19  }
   0xe   : > { %165 = sbr.rel (!%p50_p3) target bundleno = 22 (0x16), region = 24  ;;  %s167_s21 = sand.u32 (%p50_p3), 1, %s1462_s13  }
   0xf   : > { %s1242_s22 = sshll.u32 (%p50_p3), %s1470_s15, 5  ;;  %s1156_s23 = sshll.u32 (%p50_p3), %s167_s21, 6 }
  0x10   : > { %s175_s26 = scalar_lea.vmem (%p50_p3), %s1673_s0, %s1242_s22  ;;  %s169_s27 = scalar_lea.vmem (%p50_p3), [#allocation2], %s1156_s23 }
  0x11   : > { %v188_v0 = vld [vmem:[%s175_s26] sm:$0xff] (%p50_p3)  ;;  %v190_v1 = vld [vmem:[%s175_s26 + $0x8] sm:$0xff] (%p50_p3)  ;;  %v192_v2 = vld [vmem:[%s175_s26 + $0x10] sm:$0xff] (%p50_p3) }
  0x12   : > { %189 = vst [vmem:[%s169_s27] sm:$0xff] (%p50_p3), %v188_v0  ;;  %191 = vst [vmem:[%s169_s27 + $0x8] sm:$0xff] (%p50_p3), %v190_v1  ;;  %v194_v3 = vld [vmem:[%s175_s26 + $0x18] sm:$0xff] (%p50_p3)  ;;  %v196_v4 = vld [vmem:[%s175_s26 + $0x40] sm:$0xff] (%p50_p3) }
  0x13   : > { %193 = vst [vmem:[%s169_s27 + $0x10] sm:$0xff] (%p50_p3), %v192_v2  ;;  %v198_v5 = vld [vmem:[%s175_s26 + $0x48] sm:$0xff] (%p50_p3)  ;;  %195 = vst [vmem:[%s169_s27 + $0x18] sm:$0xff] (%p50_p3), %v194_v3  ;;  %v200_v6 = vld [vmem:[%s175_s26 + $0x50] sm:$0xff] (%p50_p3) }
  0x14   : > { %197 = vst [vmem:[%s169_s27 + $0x20] sm:$0xff] (%p50_p3), %v196_v4  ;;  %199 = vst [vmem:[%s169_s27 + $0x28] sm:$0xff] (%p50_p3), %v198_v5  ;;  %v202_v7 = vld [vmem:[%s175_s26 + $0x58] sm:$0xff] (%p50_p3) }
  0x15   : > { %201 = vst [vmem:[%s169_s27 + $0x30] sm:$0xff] %v200_v6  ;;  %203 = vst [vmem:[%s169_s27 + $0x38] sm:$0xff] %v202_v7 }
  0x16 PF: > { %p1159_p6 = scmp.ge.s32.totalorder %s1474_s16, 1  ;;  %p220_p7 = scmp.lt.s32.totalorder %s1474_s16, 3 }
  0x18   : > { %p221_p8 = pnand %p1159_p6, %p220_p7 }
  0x19   : > { %s227_s28 = sand.u32 (!%p221_p8), 1, %s1458_s12   ;;  %s1161_s29 = sshll.u32 (!%p221_p8), %s1466_s14, 7 }
  0x1a   : > { %224 = sbr.rel (%p221_p8) target bundleno = 340 (0x154), region = 51  ;;  %s1160_s30 = sshll.u32 (!%p221_p8), %s227_s28, 6 }
  0x1b   : > { %p267_p9 = scmp.lt.s32.totalorder (!%p221_p8), %s1161_s29, 255  ;;  %s1549_s8 = scalar_lea.vmem (!%p221_p8), [#allocation2], %s1160_s30 }
  0x1c   : > { %p1163_p10 = scmp.ne.s32.totalorder (!%p221_p8), %s1466_s14, 0 }
  0x21   : > { %s1684_s29 = smov (!%p267_p9, %s1161_s29), 255  ;;  %291 = sbr.rel (%p1163_p10) target bundleno = 40 (0x28), region = 59 }
  0x22   : > { %s1162_s4 = sshll.u32 %s1684_s29, 2  ;;  %v1476_v8 = vmov (!%p1163_p10), 0.0  }
  0x23   : > { %s1547_s7 = scalar_lea.vmem %s1674_s1, %s1162_s4  ;;  %292 = vst [vmem:[%s1676_s3] sm:$0xff] (!%p1163_p10), %v1476_v8  ;;  %293 = vst [vmem:[%s1676_s3 + $0x8] sm:$0xff] (!%p1163_p10), %v1476_v8 }
  0x28 PF: > { %v1372_v9 = vld [vmem:[%s1547_s7 + $0x40] sm:$0xff]   ;;  %v1376_v13 = vld [vmem:[%s1547_s7 + $0x48] sm:$0xff]   ;;  %v1380_v17 = vld [vmem:[%s1547_s7 + $0x50] sm:$0xff]   ;;  %p1236_p11 = scmp.ne.s32.totalorder %s1466_s14, 1 }
  0x29   : > { %v1373_v10 = vld [vmem:[%s1547_s7 + $0xc0] sm:$0xff]   ;;  %1243 = vmatprep.subr.bf16.mxu0 %v1372_v9  ;;  %v1377_v14 = vld [vmem:[%s1547_s7 + $0xc8] sm:$0xff]   ;;  %v1381_v18 = vld [vmem:[%s1547_s7 + $0xd0] sm:$0xff]  }
  0x2a   : > { %v1374_v11 = vld [vmem:[%s1547_s7] sm:$0xff]   ;;  %1265 = vmatprep.subr.bf16.mxu1 %v1373_v10  ;;  %v1378_v15 = vld [vmem:[%s1547_s7 + $0x8] sm:$0xff]   ;;  %v1382_v19 = vld [vmem:[%s1547_s7 + $0x10] sm:$0xff]  }
  0x2b   : > { %v1375_v12 = vld [vmem:[%s1547_s7 + $0x80] sm:$0xff]   ;;  %1244 = vmatpush3.bf16.msra.mxu0 %v1374_v11  ;;  %v1379_v16 = vld [vmem:[%s1547_s7 + $0x88] sm:$0xff]   ;;  %v1383_v20 = vld [vmem:[%s1547_s7 + $0x90] sm:$0xff]  }
  0x2c   : > { %1266 = vmatpush3.bf16.msra.mxu1 %v1375_v12  ;;  %1245 = vmatprep.subr.bf16.mxu0 %v1376_v13  ;;  %v1384_v21 = vld [vmem:[%s1547_s7 + $0x58] sm:$0xff]   ;;  %v1388_v25 = vld [vmem:[%s1547_s7 + $0x60] sm:$0xff]   ;;  %v1392_v29 = vld [vmem:[%s1547_s7 + $0x68] sm:$0xff]  }
  0x2d   : > { %1267 = vmatprep.subr.bf16.mxu1 %v1377_v14  ;;  %v1385_v22 = vld [vmem:[%s1547_s7 + $0xd8] sm:$0xff]   ;;  %v1389_v26 = vld [vmem:[%s1547_s7 + $0xe0] sm:$0xff]   ;;  %v1393_v30 = vld [vmem:[%s1547_s7 + $0xe8] sm:$0xff]  }
  0x2e   : > { %v1386_v23 = vld [vmem:[%s1547_s7 + $0x18] sm:$0xff]   ;;  %v1390_v27 = vld [vmem:[%s1547_s7 + $0x20] sm:$0xff]   ;;  %v1394_v31 = vld [vmem:[%s1547_s7 + $0x28] sm:$0xff]  }
  0x2f   : > { %1246 = vmatpush3.bf16.msra.mxu0 %v1378_v15  ;;  %v1387_v24 = vld [vmem:[%s1547_s7 + $0x98] sm:$0xff]   ;;  %v1391_v28 = vld [vmem:[%s1547_s7 + $0xa0] sm:$0xff]   ;;  %v1395_v32 = vld [vmem:[%s1547_s7 + $0xa8] sm:$0xff]  }
  0x30   : > { %1268 = vmatpush3.bf16.msra.mxu1 %v1379_v16  ;;  %1247 = vmatprep.subr.bf16.mxu0 %v1380_v17  ;;  %v1396_v33 = vld [vmem:[%s1547_s7 + $0x70] sm:$0xff]   ;;  %v1400_v37 = vld [vmem:[%s1547_s7 + $0x78] sm:$0xff]   ;;  %v296_v41 = vld [vmem:[%s1549_s8] sm:$0xff] }
  0x31   : > { %1269 = vmatprep.subr.bf16.mxu1 %v1381_v18  ;;  %v1397_v34 = vld [vmem:[%s1547_s7 + $0xf0] sm:$0xff]   ;;  %v1401_v38 = vld [vmem:[%s1547_s7 + $0xf8] sm:$0xff]   ;;  %v300_v42 = vld [vmem:[%s1549_s8 + $0x20] sm:$0xff] }
  0x32   : > { %v1398_v35 = vld [vmem:[%s1547_s7 + $0x30] sm:$0xff]   ;;  %v1402_v39 = vld [vmem:[%s1547_s7 + $0x38] sm:$0xff]   ;;  %v297_v43 = vld [vmem:[%s1549_s8 + $0x8] sm:$0xff]  ;;  %v1164_v44 = vcombine.low %v296_v41, %v300_v42  ;;  %v1165_v45 = vcombine.high %v296_v41, %v300_v42 }
  0x33   : > { %1248 = vmatpush3.bf16.msra.mxu0 %v1382_v19  ;;  %v1399_v36 = vld [vmem:[%s1547_s7 + $0xb0] sm:$0xff]   ;;  %v1403_v40 = vld [vmem:[%s1547_s7 + $0xb8] sm:$0xff]   ;;  %v301_v46 = vld [vmem:[%s1549_s8 + $0x28] sm:$0xff] }
  0x34   : > { %1270 = vmatpush3.bf16.msra.mxu1 %v1383_v20  ;;  %1249 = vmatprep.subr.bf16.mxu0 %v1384_v21  ;;  %v1166_v47 = vcombine.low %v297_v43, %v301_v46  ;;  %v1167_v48 = vcombine.high %v297_v43, %v301_v46  ;;  %v1404_v49 = vld [vmem:[%s1547_s7 + $0x140] sm:$0xff]   ;;  %v1408_v53 = vld [vmem:[%s1547_s7 + $0x148] sm:$0xff]   ;;  %v1412_v57 = vld [vmem:[%s1547_s7 + $0x150] sm:$0xff]  }
  0x35   : > { %1271 = vmatprep.subr.bf16.mxu1 %v1385_v22  ;;  %888 = vmatprep.mubr.bf16.mxu0 %v1165_v45  ;;  %v1405_v50 = vld [vmem:[%s1547_s7 + $0x1c0] sm:$0xff]   ;;  %v1409_v54 = vld [vmem:[%s1547_s7 + $0x1c8] sm:$0xff]   ;;  %v1413_v58 = vld [vmem:[%s1547_s7 + $0x1d0] sm:$0xff]  }
  0x36   : > { %929 = vmatprep.mubr.bf16.mxu1 %v1167_v48  ;;  %v1406_v51 = vld [vmem:[%s1547_s7 + $0x100] sm:$0xff]   ;;  %v1410_v55 = vld [vmem:[%s1547_s7 + $0x108] sm:$0xff]   ;;  %v1414_v59 = vld [vmem:[%s1547_s7 + $0x110] sm:$0xff]  }
  0x37   : > { %1250 = vmatpush3.bf16.msra.mxu0 %v1386_v23  ;;  %v1407_v52 = vld [vmem:[%s1547_s7 + $0x180] sm:$0xff]   ;;  %v1411_v56 = vld [vmem:[%s1547_s7 + $0x188] sm:$0xff]   ;;  %v1415_v60 = vld [vmem:[%s1547_s7 + $0x190] sm:$0xff]  }
  0x38   : > { %1272 = vmatpush3.bf16.msra.mxu1 %v1387_v24  ;;  %1251 = vmatprep.subr.bf16.mxu0 %v1388_v25  ;;  %v1416_v61 = vld [vmem:[%s1547_s7 + $0x158] sm:$0xff]   ;;  %v1420_v1 = vld [vmem:[%s1547_s7 + $0x160] sm:$0xff]   ;;  %v1424_v5 = vld [vmem:[%s1547_s7 + $0x168] sm:$0xff]  }
  0x39   : > { %1273 = vmatprep.subr.bf16.mxu1 %v1389_v26  ;;  %v1417_v62 = vld [vmem:[%s1547_s7 + $0x1d8] sm:$0xff]   ;;  %v1421_v2 = vld [vmem:[%s1547_s7 + $0x1e0] sm:$0xff]   ;;  %v1425_v6 = vld [vmem:[%s1547_s7 + $0x1e8] sm:$0xff]  }
  0x3a   : > { %v1418_v63 = vld [vmem:[%s1547_s7 + $0x118] sm:$0xff]   ;;  %v1422_v3 = vld [vmem:[%s1547_s7 + $0x120] sm:$0xff]   ;;  %v1426_v7 = vld [vmem:[%s1547_s7 + $0x128] sm:$0xff]  }
  0x3b   : > { %1252 = vmatpush3.bf16.msra.mxu0 %v1390_v27  ;;  %v1419_v0 = vld [vmem:[%s1547_s7 + $0x198] sm:$0xff]   ;;  %v1423_v4 = vld [vmem:[%s1547_s7 + $0x1a0] sm:$0xff]   ;;  %v1427_v8 = vld [vmem:[%s1547_s7 + $0x1a8] sm:$0xff]  }
  0x3c   : > { %1274 = vmatpush3.bf16.msra.mxu1 %v1391_v28  ;;  %1253 = vmatprep.subr.bf16.mxu0 %v1392_v29  ;;  %v1428_v9 = vld [vmem:[%s1547_s7 + $0x170] sm:$0xff]   ;;  %v1432_v13 = vld [vmem:[%s1547_s7 + $0x178] sm:$0xff]  }
  0x3d   : > { %1275 = vmatprep.subr.bf16.mxu1 %v1393_v30  ;;  %v1429_v10 = vld [vmem:[%s1547_s7 + $0x1f0] sm:$0xff]   ;;  %v1433_v14 = vld [vmem:[%s1547_s7 + $0x1f8] sm:$0xff]  }
  0x3e   : > { %v1430_v11 = vld [vmem:[%s1547_s7 + $0x130] sm:$0xff]   ;;  %v1434_v15 = vld [vmem:[%s1547_s7 + $0x138] sm:$0xff]  }
  0x3f   : > { %1254 = vmatpush3.bf16.msra.mxu0 %v1394_v31  ;;  %v1431_v12 = vld [vmem:[%s1547_s7 + $0x1b0] sm:$0xff]   ;;  %v1435_v16 = vld [vmem:[%s1547_s7 + $0x1b8] sm:$0xff]  }
  0x40   : > { %1276 = vmatpush3.bf16.msra.mxu1 %v1395_v32  ;;  %1255 = vmatprep.subr.bf16.mxu0 %v1396_v33  ;;  %v298_v17 = vld [vmem:[%s1549_s8 + $0x10] sm:$0xff]  ;;  %v299_v21 = vld [vmem:[%s1549_s8 + $0x18] sm:$0xff] }
  0x41   : > { %1277 = vmatprep.subr.bf16.mxu1 %v1397_v34  ;;  %v302_v18 = vld [vmem:[%s1549_s8 + $0x30] sm:$0xff]  ;;  %v303_v22 = vld [vmem:[%s1549_s8 + $0x38] sm:$0xff] }
  0x42   : > { %v1168_v19 = vcombine.low %v298_v17, %v302_v18  ;;  %v1169_v20 = vcombine.high %v298_v17, %v302_v18  ;;  %v1170_v23 = vcombine.low %v299_v21, %v303_v22  ;;  %v1171_v24 = vcombine.high %v299_v21, %v303_v22 }
  0x43   : > { %1256 = vmatpush3.bf16.msra.mxu0 %v1398_v35 }
  0x44   : > { %1278 = vmatpush3.bf16.msra.mxu1 %v1399_v36  ;;  %1257 = vmatprep.subr.bf16.mxu0 %v1400_v37 }
  0x45   : > { %1279 = vmatprep.subr.bf16.mxu1 %v1401_v38 }
  0x47   : > { %1258 = vmatpush3.bf16.msra.mxu0 %v1402_v39 }
  0x48   : > { %1280 = vmatpush3.bf16.msra.mxu1 %v1403_v40  ;;  %1287 = vmatprep.subr.bf16.mxu0 %v1404_v49 }
  0x49   : > { %1309 = vmatprep.subr.bf16.mxu1 %v1405_v50 }
  0x4a   : > { %889 = vmatmul.mubr.bf16.vlgmr.msra.gmra.mrb[0].mxu0 %v1164_v44 }
  0x4b   : > { %930 = vmatmul.mubr.bf16.vlgmr.msra.gmra.mrb[0].mxu1 %v1166_v47  ;;  %1288 = vmatpush3.bf16.msra.mxu0 %v1406_v51  ;;  %v294_v51 = vld [vmem:[%s1676_s3] sm:$0xff] }
  0x4c   : > { %1310 = vmatpush3.bf16.msra.mxu1 %v1407_v52  ;;  %1289 = vmatprep.subr.bf16.mxu0 %v1408_v53 }
  0x4d   : > { %1311 = vmatprep.subr.bf16.mxu1 %v1409_v54  ;;  %970 = vmatprep.mubr.bf16.mxu0 %v1169_v20 }
  0x4e   : > { %1011 = vmatprep.mubr.bf16.mxu1 %v1171_v24 }
  0x4f   : > { %1290 = vmatpush3.bf16.msra.mxu0 %v1410_v55  ;;  %v295_v55 = vld [vmem:[%s1676_s3 + $0x8] sm:$0xff] }
  0x50   : > { %1312 = vmatpush3.bf16.msra.mxu1 %v1411_v56  ;;  %1291 = vmatprep.subr.bf16.mxu0 %v1412_v57 }
  0x51   : > { %1313 = vmatprep.subr.bf16.mxu1 %v1413_v58 }
  0x53   : > { %1292 = vmatpush3.bf16.msra.mxu0 %v1414_v59 }
  0x54   : > { %1314 = vmatpush3.bf16.msra.mxu1 %v1415_v60  ;;  %1293 = vmatprep.subr.bf16.mxu0 %v1416_v61  ;;  %v1237_v60 = vld [vmem:[%s1675_s2] ss:$0 sm:$0xff] (!%p1236_p11) }
  0x55   : > { %1315 = vmatprep.subr.bf16.mxu1 %v1417_v62 }
  0x57   : > { %1294 = vmatpush3.bf16.msra.mxu0 %v1418_v63 }
  0x58   : > { %1316 = vmatpush3.bf16.msra.mxu1 %v1419_v0  ;;  %1295 = vmatprep.subr.bf16.mxu0 %v1420_v1 }
  0x59   : > { %1317 = vmatprep.subr.bf16.mxu1 %v1421_v2 }
  0x5b   : > { %1296 = vmatpush3.bf16.msra.mxu0 %v1422_v3 }
  0x5c   : > { %1318 = vmatpush3.bf16.msra.mxu1 %v1423_v4  ;;  %1297 = vmatprep.subr.bf16.mxu0 %v1424_v5 }
  0x5d   : > { %1319 = vmatprep.subr.bf16.mxu1 %v1425_v6 }
  0x5f   : > { %1298 = vmatpush3.bf16.msra.mxu0 %v1426_v7 }
  0x60   : > { %1320 = vmatpush3.bf16.msra.mxu1 %v1427_v8  ;;  %1299 = vmatprep.subr.bf16.mxu0 %v1428_v9 }
  0x61   : > { %1321 = vmatprep.subr.bf16.mxu1 %v1429_v10 }
  0x63   : > { %1300 = vmatpush3.bf16.msra.mxu0 %v1430_v11 }
  0x64   : > { %1322 = vmatpush3.bf16.msra.mxu1 %v1431_v12  ;;  %1301 = vmatprep.subr.bf16.mxu0 %v1432_v13 }
  0x65   : > { %1323 = vmatprep.subr.bf16.mxu1 %v1433_v14 }
  0x67   : > { %1302 = vmatpush3.bf16.msra.mxu0 %v1434_v15 }
  0x68   : > { %1324 = vmatpush3.bf16.msra.mxu1 %v1435_v16 }
  0x6a   : > { %971 = vmatmul.mubr.bf16.vlgmr.msra.gmra.mrb[4].mxu0 %v1168_v19 }
  0x6b   : > { %1012 = vmatmul.mubr.bf16.vlgmr.msra.gmra.mrb[4].mxu1 %v1170_v23 }
 0x11d   : > { %v1259_v25 = vpop.f32.mrb[0].mxu0 }
 0x11e   : > { %v1281_v26 = vpop.f32.mrb[0].mxu1  ;;  %v1260_v27 = vpop.f32.mrb[1].mxu0 }
 0x11f   : > { %v1261_v28 = vadd.f32 %v1260_v27, %v1259_v25  ;;  %v1282_v29 = vpop.f32.mrb[1].mxu1  ;;  %v1262_v30 = vpop.f32.mrb[2].mxu0 }
 0x120   : > { %v1283_v31 = vadd.f32 %v1282_v29, %v1281_v26  ;;  %v1284_v32 = vpop.f32.mrb[2].mxu1  ;;  %v1263_v33 = vpop.f32.mrb[3].mxu0 }
 0x121   : > { %v1264_v34 = vadd.f32 %v1263_v33, %v1262_v30  ;;  %v1285_v35 = vpop.f32.mrb[3].mxu1 }
 0x122   : > { %v932_v36 = vadd.f32 %v1283_v31, %v1261_v28  ;;  %v1286_v37 = vadd.f32 %v1285_v35, %v1284_v32 }
 0x124   : > { %v935_v38 = vadd.f32 %v1286_v37, %v1264_v34 }
 0x13d   : > { %v1303_v39 = vpop.f32.mrb[4].mxu0 }
 0x13e   : > { %v1325_v40 = vpop.f32.mrb[4].mxu1  ;;  %v1304_v41 = vpop.f32.mrb[5].mxu0 }
 0x13f   : > { %v1305_v42 = vadd.f32 %v1304_v41, %v1303_v39  ;;  %v1326_v43 = vpop.f32.mrb[5].mxu1  ;;  %v1306_v44 = vpop.f32.mrb[6].mxu0 }
 0x140   : > { %v1327_v45 = vadd.f32 %v1326_v43, %v1325_v40  ;;  %v1328_v46 = vpop.f32.mrb[6].mxu1  ;;  %v1307_v47 = vpop.f32.mrb[7].mxu0 }
 0x141   : > { %v973_v48 = vadd.f32 %v1305_v42, %v932_v36  ;;  %v1308_v49 = vadd.f32 %v1307_v47, %v1306_v44  ;;  %v1329_v50 = vpop.f32.mrb[7].mxu1 }
 0x142   : > { %v1330_v52 = vadd.f32 %v1329_v50, %v1328_v46 }
 0x143   : > { %v1014_v53 = vadd.f32 %v1327_v45, %v973_v48  ;;  %v976_v54 = vadd.f32 %v1308_v49, %v935_v38  ;;  %1027 = sbr.rel (%p1236_p11) target bundleno = 340 (0x154), region = 63 }
 0x145   : > { %v1020_v56 = vadd.f32 %v1014_v53, %v294_v51  ;;  %v1017_v57 = vadd.f32 %v1330_v52, %v976_v54 }
 0x147   : > { %1022 = vst [vmem:[%s1676_s3] sm:$0xff] %v1020_v56  ;;  %v1021_v58 = vadd.f32 %v1017_v57, %v295_v55 }
 0x149   : > { %1023 = vst [vmem:[%s1676_s3 + $0x8] sm:$0xff] %v1021_v58 }
 0x14e   : > { %v1028_v59 = vld [vmem:[%s1676_s3] sm:$0xff] }
 0x14f   : > { %v1037_v62 = vadd.f32 %v1237_v60, %v1028_v59 }
 0x150   : > { %v1029_v61 = vld [vmem:[%s1676_s3 + $0x8] sm:$0xff] }
 0x151   : > { %v1038_v63 = vadd.f32 %v1237_v60, %v1029_v61  ;;  %1039 = vst [vmem:[%s1676_s3] sm:$0xff] %v1037_v62 }
 0x153   : > { %1040 = vst [vmem:[%s1676_s3 + $0x8] sm:$0xff] %v1038_v63 }
 0x154 PF: > { %s13_s16 = sadd.s32 1, %s1474_s16   ;;  %s1677_s12 = smov %s1462_s13 }
 0x155   : > { %p10_p12 = scmp.ge.s32.totalorder %s13_s16, 4   ;;  %s1678_s13 = smov %s1532_s20 }
 0x156   : > { %s1679_s14 = smov %s1470_s15  ;;  %s1680_s15 = smov %s1682_s17 }
 0x157   :  { %12 = sbr.rel (!%p10_p12) target bundleno = 3 (0x3), region = 104 }

</bundles_post_ra>
